<compile_context>
chip_gen: v7x
topology: tpu7x:2x2x1
jax: 0.10.0
libtpu: 0.0.40
codegen_flags: <defaults>
</compile_context>

<pallas_src>
import functools

import jax
import jax.numpy as jnp
from jax.experimental import pallas as pl
from jax.experimental.pallas import tpu as pltpu

CONFIG = [(32, 3, 1), (64, 3, 2), ['B', 1], (128, 3, 2), ['B', 2], (256, 3, 2),
          ['B', 8], (512, 3, 2), ['B', 8], (1024, 3, 2), ['B', 4],
          (512, 1, 1), (1024, 3, 1), 'S', (256, 1, 1), 'U',
          (256, 1, 1), (512, 3, 1), 'S', (128, 1, 1), 'U',
          (128, 1, 1), (256, 3, 1), 'S']

_BN_EPS = 1e-5            # nn.BatchNorm2d default
_LEAKY = 0.1              # nn.LeakyReLU(0.1)
_LANE = 128               # TPU lane width

_PROFILE = None


def _round_up(x, m):
    return (x + m - 1) // m * m


def _profile():
    """Per-generation tile / VMEM budget (64 MiB v7x vs 128 MiB v5e/v6e)."""
    global _PROFILE
    if _PROFILE is None:
        try:
            vmem_cap = int(pltpu.get_tpu_info().vmem_capacity_bytes)
        except Exception:
            vmem_cap = 128 * 1024 * 1024
        if vmem_cap >= 100 * 1024 * 1024:
            _PROFILE = dict(tm=1024, tn_cap=512, tk_cap=1024,
                            step_budget=20 * 1024 * 1024,
                            vmem_limit=64 * 1024 * 1024)
        else:  # v7x: 64 MiB physical VMEM
            _PROFILE = dict(tm=512, tn_cap=256, tk_cap=512,
                            step_budget=10 * 1024 * 1024,
                            vmem_limit=40 * 1024 * 1024)
    return _PROFILE


def _pick_tm(M):
    prof = _profile()
    if M <= prof["tm"]:
        return _round_up(M, 16)        # bf16 sublane packing: keep multiples of 16
    return prof["tm"]


def _pick_tn(cout_pad):
    return min(_profile()["tn_cap"], cout_pad)


def _pick_tk(Kpad, tm, tn):
    prof = _profile()

    def step_bytes(tk):
        return (2 * tm * tk * 2       # double-buffered bf16 patches
                + 2 * tk * tn * 2     # double-buffered bf16 weights
                + 2 * tm * tn * 2     # double-buffered bf16 output
                + tm * tn * 4         # f32 accumulator scratch
                + 2 * 8 * tn * 4)     # stats block

    if step_bytes(Kpad) <= prof["step_budget"]:
        return Kpad                   # collapse the K loop entirely
    nk = Kpad // _LANE
    best = _LANE
    for q in range(1, nk + 1):
        if nk % q == 0:
            tk = q * _LANE
            if tk <= prof["tk_cap"] and step_bytes(tk) <= prof["step_budget"]:
                best = max(best, tk)
    return best


# ----------------------------- Pallas kernels ------------------------------

def _conv_stats_kernel(p_ref, w_ref, y_ref, stats_ref, acc_ref):
    """im2col GEMM, f32 VMEM accumulation, bf16 output + per-tile BN partials."""
    k = pl.program_id(2)

    @pl.when(k == 0)
    def _():
        acc_ref[...] = jnp.zeros_like(acc_ref)

    acc_ref[...] += jnp.dot(p_ref[...], w_ref[...],
                            preferred_element_type=jnp.float32)

    @pl.when(k == pl.num_programs(2) - 1)
    def _():
        a = acc_ref[...]
        y_ref[...] = a.astype(y_ref.dtype)
        s1 = jnp.sum(a, axis=0, keepdims=True)        # (1, tn) channel sum
        s2 = jnp.sum(a * a, axis=0, keepdims=True)    # (1, tn) channel sum of sq
        row = jax.lax.broadcasted_iota(jnp.int32, (8, a.shape[1]), 0)
        st = jnp.where(row == 0, s1, 0.0) + jnp.where(row == 1, s2, 0.0)
        stats_ref[...] = st.reshape((1,) + st.shape)


def _make_apply_kernel(tm, m_real, m_pad, has_res):
    """BN(scale/shift) + LeakyReLU(0.1) [+ residual], padded rows forced to 0."""
    need_mask = m_pad > m_real

    def kernel(*refs):
        if has_res:
            y_ref, sc_ref, sh_ref, r_ref, o_ref = refs
        else:
            y_ref, sc_ref, sh_ref, o_ref = refs
        z = y_ref[...].astype(jnp.float32) * sc_ref[...] + sh_ref[...]
        z = jnp.where(z > 0, z, _LEAKY * z)
        if has_res:
            z = z + r_ref[...].astype(jnp.float32)
        if need_mask:
            rows = (jax.lax.broadcasted_iota(jnp.int32, z.shape, 0)
                    + pl.program_id(0) * tm)
            z = jnp.where(rows < m_real, z, 0.0)
        o_ref[...] = z.astype(o_ref.dtype)

    return kernel


def _gemm_bias_kernel(p_ref, w_ref, b_ref, o_ref):
    """bn_act=False head conv: GEMM + bias, f32 output, no activation."""
    k = pl.program_id(2)

    @pl.when(k == 0)
    def _():
        o_ref[...] = jnp.zeros_like(o_ref)

    o_ref[...] += jnp.dot(p_ref[...], w_ref[...],
                          preferred_element_type=jnp.float32)

    @pl.when(k == pl.num_programs(2) - 1)
    def _():
        o_ref[...] = o_ref[...] + b_ref[...]


# ----------------------------- Pallas wrappers -----------------------------

@functools.partial(jax.jit, static_argnames=("tm", "tn", "tk"))
def _conv_gemm_stats(patches, w, *, tm, tn, tk):
    M_pad, Kpad = patches.shape
    Cp = w.shape[1]
    nmt = M_pad // tm
    return pl.pallas_call(
        _conv_stats_kernel,
        out_shape=(jax.ShapeDtypeStruct((M_pad, Cp), jnp.bfloat16),
                   jax.ShapeDtypeStruct((nmt, 8, Cp), jnp.float32)),
        grid_spec=pltpu.PrefetchScalarGridSpec(
            num_scalar_prefetch=0,
            grid=(nmt, Cp // tn, Kpad // tk),
            in_specs=[pl.BlockSpec((tm, tk), lambda mi, j, k: (mi, k)),
                      pl.BlockSpec((tk, tn), lambda mi, j, k: (k, j))],
            out_specs=[pl.BlockSpec((tm, tn), lambda mi, j, k: (mi, j)),
                       pl.BlockSpec((1, 8, tn), lambda mi, j, k: (mi, 0, j))],
            scratch_shapes=[pltpu.VMEM((tm, tn), jnp.float32)]),
        compiler_params=pltpu.CompilerParams(
            dimension_semantics=("parallel", "parallel", "arbitrary"),
            vmem_limit_bytes=_profile()["vmem_limit"]),
    )(patches, w)


@functools.partial(jax.jit, static_argnames=("tm", "tn", "m_real"))
def _bn_leaky_apply(y, scale, shift, *, tm, tn, m_real):
    M_pad, Cp = y.shape
    blk = pl.BlockSpec((tm, tn), lambda mi, j: (mi, j))
    vec = pl.BlockSpec((1, tn), lambda mi, j: (0, j))
    return pl.pallas_call(
        _make_apply_kernel(tm, m_real, M_pad, has_res=False),
        out_shape=jax.ShapeDtypeStruct((M_pad, Cp), jnp.bfloat16),
        grid_spec=pltpu.PrefetchScalarGridSpec(
            num_scalar_prefetch=0,
            grid=(M_pad // tm, Cp // tn),
            in_specs=[blk, vec, vec],
            out_specs=blk),
        compiler_params=pltpu.CompilerParams(
            dimension_semantics=("parallel", "parallel"),
            vmem_limit_bytes=_profile()["vmem_limit"]),
    )(y, scale, shift)


@functools.partial(jax.jit, static_argnames=("tm", "tn", "m_real"))
def _bn_leaky_apply_res(y, scale, shift, res, *, tm, tn, m_real):
    M_pad, Cp = y.shape
    blk = pl.BlockSpec((tm, tn), lambda mi, j: (mi, j))
    vec = pl.BlockSpec((1, tn), lambda mi, j: (0, j))
    return pl.pallas_call(
        _make_apply_kernel(tm, m_real, M_pad, has_res=True),
        out_shape=jax.ShapeDtypeStruct((M_pad, Cp), jnp.bfloat16),
        grid_spec=pltpu.PrefetchScalarGridSpec(
            num_scalar_prefetch=0,
            grid=(M_pad // tm, Cp // tn),
            in_specs=[blk, vec, vec, blk],
            out_specs=blk),
        compiler_params=pltpu.CompilerParams(
            dimension_semantics=("parallel", "parallel"),
            vmem_limit_bytes=_profile()["vmem_limit"]),
    )(y, scale, shift, res)


@functools.partial(jax.jit, static_argnames=("tm", "tn", "tk"))
def _gemm_bias(patches, w, bias, *, tm, tn, tk):
    M_pad, Kpad = patches.shape
    Cp = w.shape[1]
    return pl.pallas_call(
        _gemm_bias_kernel,
        out_shape=jax.ShapeDtypeStruct((M_pad, Cp), jnp.float32),
        grid_spec=pltpu.PrefetchScalarGridSpec(
            num_scalar_prefetch=0,
            grid=(M_pad // tm, Cp // tn, Kpad // tk),
            in_specs=[pl.BlockSpec((tm, tk), lambda mi, j, k: (mi, k)),
                      pl.BlockSpec((tk, tn), lambda mi, j, k: (k, j)),
                      pl.BlockSpec((1, tn), lambda mi, j, k: (0, j))],
            out_specs=pl.BlockSpec((tm, tn), lambda mi, j, k: (mi, j))),
        compiler_params=pltpu.CompilerParams(
            dimension_semantics=("parallel", "parallel", "arbitrary"),
            vmem_limit_bytes=_profile()["vmem_limit"]),
    )(patches, w, bias)


def _bn_scale_shift(stats, gamma, beta, m_real):
    """Combine per-M-tile partials into per-channel scale/shift vectors."""
    s1 = jnp.sum(stats[:, 0, :], axis=0)
    s2 = jnp.sum(stats[:, 1, :], axis=0)
    mean = s1 / m_real
    var = jnp.maximum(s2 / m_real - mean * mean, 0.0)
    inv = jax.lax.rsqrt(var + _BN_EPS)
    scale = gamma[0] * inv
    shift = beta[0] - mean * scale
    return scale[None, :], shift[None, :]


# ------------------------------- Conv glue ---------------------------------

def _im2col(x, k, s, p):
    """x: (N, H, W, C) -> bf16 patches (N*Ho*Wo, k*k*C), (ky, kx, c) order."""
    x = x.astype(jnp.bfloat16)
    N, H, W, C = x.shape
    if p > 0:
        x = jnp.pad(x, ((0, 0), (p, p), (p, p), (0, 0)))
    Ho = (H + 2 * p - k) // s + 1
    Wo = (W + 2 * p - k) // s + 1
    if k == 1 and s == 1:
        return x.reshape(N * Ho * Wo, C), Ho, Wo
    # TODO(synk): replace with in-kernel per-tap accumulation (halo'd slabs).
    cols = [x[:, ky:ky + s * (Ho - 1) + 1:s, kx:kx + s * (Wo - 1) + 1:s, :]
            for ky in range(k) for kx in range(k)]
    patches = jnp.concatenate(cols, axis=-1)
    return patches.reshape(N * Ho * Wo, k * k * C), Ho, Wo


def _from_nhwc(x):
    """Wrap an NHWC tensor as a flat (M_pad, C) bf16 activation record."""
    N, H, W, C = x.shape
    M = N * H * W
    tm = _pick_tm(M)
    M_pad = _round_up(M, tm)
    flat = x.reshape(M, C).astype(jnp.bfloat16)
    if M_pad > M:
        flat = jnp.pad(flat, ((0, M_pad - M), (0, 0)))
    return dict(flat=flat, N=N, H=H, W=W, Cp=C, M=M, M_pad=M_pad)


def _to_nhwc(act):
    N, H, W, Cp = act["N"], act["H"], act["W"], act["Cp"]
    return act["flat"][:N * H * W].reshape(N, H, W, Cp)


def _make_conv(key, cin_real, cin_carry, cout, ksize, stride, pad, bn_act):
    """Conv layer params.  Input carries `cin_carry` channels (first cin_real
    real, rest zero padding); output carries round_up(cout, 128) channels."""
    kk = ksize * ksize
    cout_pad = _round_up(cout, _LANE)
    K = kk * cin_carry
    Kpad = _round_up(K, _LANE)
    kw, kb = jax.random.split(key)
    fan_in = cin_real * kk
    w = jax.random.normal(kw, (kk, cin_real, cout), jnp.float32)
    w = w * (2.0 / fan_in) ** 0.5
    w = jnp.pad(w, ((0, 0), (0, cin_carry - cin_real), (0, cout_pad - cout)))
    w = w.reshape(K, cout_pad)
    if Kpad != K:
        w = jnp.pad(w, ((0, Kpad - K), (0, 0)))
    layer = dict(kind="conv", ksize=ksize, stride=stride, pad=pad,
                 bn_act=bn_act, cout=cout, cout_pad=cout_pad, Kpad=Kpad,
                 w=w.astype(jnp.bfloat16))
    if bn_act:
        gamma = jnp.pad(jnp.ones((1, cout), jnp.float32),
                        ((0, 0), (0, cout_pad - cout)))
        layer["gamma"] = gamma
        layer["beta"] = jnp.zeros((1, cout_pad), jnp.float32)
    else:
        bound = 1.0 / (fan_in ** 0.5)
        bias = jax.random.uniform(kb, (1, cout), jnp.float32,
                                  minval=-bound, maxval=bound)
        layer["bias"] = jnp.pad(bias, ((0, 0), (0, cout_pad - cout)))
    return layer


def _conv_block(act, layer, shortcut=None):
    N = act["N"]
    if (layer["ksize"] == 1 and layer["stride"] == 1
            and act["Cp"] == layer["Kpad"]):
        # 1x1 stride-1 conv: the flat activation IS the (already padded) patch matrix.
        patches = act["flat"]
        Ho, Wo, M, M_pad = act["H"], act["W"], act["M"], act["M_pad"]
        tm = _pick_tm(M)
    else:
        x = _to_nhwc(act)
        patches, Ho, Wo = _im2col(x, layer["ksize"], layer["stride"],
                                  layer["pad"])
        M = N * Ho * Wo
        tm = _pick_tm(M)
        M_pad = _round_up(M, tm)
        padr = M_pad - patches.shape[0]
        padc = layer["Kpad"] - patches.shape[1]
        if padr or padc:
            patches = jnp.pad(patches, ((0, padr), (0, padc)))
    Cp = layer["cout_pad"]
    tn = _pick_tn(Cp)
    tk = _pick_tk(layer["Kpad"], tm, tn)
    if layer["bn_act"]:
        y, stats = _conv_gemm_stats(patches, layer["w"], tm=tm, tn=tn, tk=tk)
        scale, shift = _bn_scale_shift(stats, layer["gamma"], layer["beta"], M)
        if shortcut is not None:
            flat = _bn_leaky_apply_res(y, scale, shift, shortcut,
                                       tm=tm, tn=tn, m_real=M)
        else:
            flat = _bn_leaky_apply(y, scale, shift, tm=tm, tn=tn, m_real=M)
    else:
        flat = _gemm_bias(patches, layer["w"], layer["bias"],
                          tm=tm, tn=tn, tk=tk)
    return dict(flat=flat, N=N, H=Ho, W=Wo, Cp=Cp, M=M, M_pad=M_pad)


# --------------------------- Model construction ----------------------------

def build_yolo_v3(key, in_channels=3, num_classes=80):
    layers = []
    c_real, c_carry = in_channels, in_channels  # network input is not padded
    route_channels = []
    for module in CONFIG:
        if isinstance(module, tuple):
            out_c, ksize, stride = module
            key, sk = jax.random.split(key)
            layers.append(_make_conv(sk, c_real, c_carry, out_c, ksize, stride,
                                     1 if ksize == 3 else 0, True))
            c_real, c_carry = out_c, _round_up(out_c, _LANE)
        elif isinstance(module, list):
            n = module[1]
            half = c_real // 2
            half_carry = _round_up(half, _LANE)
            reps = []
            for _ in range(n):
                key, k1, k2 = jax.random.split(key, 3)
                reps.append((_make_conv(k1, c_real, c_carry, half, 1, 1, 0, True),
                             _make_conv(k2, half, half_carry, c_real, 3, 1, 1,
                                        True)))
            layers.append(dict(kind="residual", use_residual=True,
                               num_repeats=n, reps=reps))
            c_carry = _round_up(c_real, _LANE)
            if n == 8:
                route_channels.append((c_real, c_carry))
        elif module == 'S':
            key, k1, k2, k3, k4, k5 = jax.random.split(key, 6)
            half = c_real // 2
            half_carry = _round_up(half, _LANE)
            layers.append(dict(
                kind="residual", use_residual=False, num_repeats=1,
                reps=[(_make_conv(k1, c_real, c_carry, half, 1, 1, 0, True),
                       _make_conv(k2, half, half_carry, c_real, 3, 1, 1,
                                  True))]))
            c_carry = _round_up(c_real, _LANE)
            layers.append(_make_conv(k3, c_real, c_carry, half, 1, 1, 0, True))
            c_real, c_carry = half, half_carry
            layers.append(dict(
                kind="scale",
                c1=_make_conv(k4, c_real, c_carry, 2 * c_real, 3, 1, 1, True),
                c2=_make_conv(k5, 2 * c_real, _round_up(2 * c_real, _LANE),
                              3 * (num_classes + 5), 1, 1, 0, False)))
        elif module == 'U':
            layers.append(dict(kind="upsample"))
            r_real, r_carry = route_channels.pop()
            # at both concat points neither tensor carries channel padding,
            # so the concatenated channel layout is [real | real] as assumed.
            assert c_real == c_carry and r_real == r_carry
            c_real, c_carry = c_real + r_real, c_carry + r_carry
    return layers


def yolo_v3_forward(x_nchw, layers, num_classes):
    x = jnp.transpose(x_nchw, (0, 2, 3, 1)).astype(jnp.float32)  # NCHW -> NHWC
    act = _from_nhwc(x)
    outputs = []
    routes = []
    for layer in layers:
        kind = layer["kind"]
        if kind == "conv":
            act = _conv_block(act, layer)
        elif kind == "residual":
            for c1, c2 in layer["reps"]:
                if layer["use_residual"]:
                    # shortcut add fused into the BN/Leaky apply kernel
                    act = _conv_block(_conv_block(act, c1), c2,
                                      shortcut=act["flat"])
                else:
                    act = _conv_block(_conv_block(act, c1), c2)
            if layer["num_repeats"] == 8:
                routes.append(act)
        elif kind == "scale":
            y = _conv_block(act, layer["c1"])
            h = _conv_block(y, layer["c2"])
            N, H, W = h["N"], h["H"], h["W"]
            o = h["flat"][:N * H * W, :3 * (num_classes + 5)]
            # NHWC channel c = anchor*(nc+5)+attr  ==  PyTorch reshape+permute
            out = o.reshape(N, H, W, 3, num_classes + 5).transpose(0, 3, 1, 2, 4)
            outputs.append(out)
        elif kind == "upsample":
            # TODO(synk): fuse the 2x nearest upsample + concat into the next
            # 1x1 conv; kept as plain JAX glue (pure data movement).
            xn = _to_nhwc(act)
            xn = jnp.repeat(jnp.repeat(xn, 2, axis=1), 2, axis=2)
            rn = _to_nhwc(routes.pop())
            act = _from_nhwc(jnp.concatenate([xn, rn], axis=-1))
    return outputs


# ----------------------------------- main -----------------------------------

if __name__ == "__main__":
    num_classes = 80
    in_channels = 3
    key = jax.random.PRNGKey(0)
    key, xkey, pkey = jax.random.split(key, 3)

    # NCHW input, like PyTorch.  32x32 is the smallest spatial size divisible
    # by the total stride (32), giving prediction grids of 1x1, 2x2, 4x4.
    x = jax.random.normal(xkey, (2, in_channels, 32, 32), jnp.float32)

    layers = build_yolo_v3(pkey, in_channels, num_classes)
    outputs = yolo_v3_forward(x, layers, num_classes)
    outputs = jax.block_until_ready(outputs)

    expected = [(2, 3, 1, 1, num_classes + 5),
                (2, 3, 2, 2, num_classes + 5),
                (2, 3, 4, 4, num_classes + 5)]
    assert [tuple(o.shape) for o in outputs] == expected, \
        [tuple(o.shape) for o in outputs]
    assert all(bool(jnp.all(jnp.isfinite(o))) for o in outputs)
    print("KERNEL_OK")
</pallas_src>

<mosaic_0001>
module attributes {stable_mosaic.version = 11 : i64} {
  func.func @_conv_stats_kernel(%arg0: i32, %arg1: i32, %arg2: i32, %arg3: memref<1024x128xbf16, #tpu.memory_space<vmem>>, %arg4: memref<128x128xbf16, #tpu.memory_space<vmem>>, %arg5: memref<1024x128xbf16, #tpu.memory_space<vmem>>, %arg6: memref<1x8x128xf32, #tpu.memory_space<vmem>>, %arg7: memref<1024x128xf32, #tpu.memory_space<vmem>>) attributes {dimension_semantics = [#tpu.dimension_semantics<parallel>, #tpu.dimension_semantics<parallel>, #tpu.dimension_semantics<arbitrary>], iteration_bounds = array<i64: 2, 1, 1>, scalar_prefetch = 0 : i64, scratch_operands = 1 : i64, tpu.core_type = #tpu.core_type<tc>, window_params = [{transform_indices = @transform_0, window_bounds = array<i64: 1024, 128>}, {transform_indices = @transform_1, window_bounds = array<i64: 128, 128>}, {transform_indices = @transform_2, window_bounds = array<i64: 1024, 128>}, {transform_indices = @transform_3, window_bounds = array<i64: 1, 8, 128>}]} {
    %c0_i32 = arith.constant 0 : i32
    %0 = arith.cmpi eq, %arg2, %c0_i32 : i32
    %1 = arith.extui %0 : i1 to i32
    %c0_i32_0 = arith.constant 0 : i32
    %2 = arith.cmpi ne, %1, %c0_i32_0 : i32
    scf.if %2 {
      %cst_10 = arith.constant 0.000000e+00 : f32
      %12 = vector.broadcast %cst_10 : f32 to vector<1024x128xf32>
      %c0_11 = arith.constant 0 : index
      %c0_12 = arith.constant 0 : index
      %13 = vector.load %arg7[%c0_11, %c0_12] : memref<1024x128xf32, #tpu.memory_space<vmem>>, vector<1024x128xf32>
      tpu.vector_store %arg7[%c0_11, %c0_12], %12 {strides = array<i32>} : memref<1024x128xf32, #tpu.memory_space<vmem>>, vector<1024x128xf32>,
    } else {
    }
    %c0 = arith.constant 0 : index
    %c0_1 = arith.constant 0 : index
    %3 = vector.load %arg7[%c0, %c0_1] : memref<1024x128xf32, #tpu.memory_space<vmem>>, vector<1024x128xf32>
    %c0_2 = arith.constant 0 : index
    %c0_3 = arith.constant 0 : index
    %4 = vector.load %arg3[%c0_2, %c0_3] : memref<1024x128xbf16, #tpu.memory_space<vmem>>, vector<1024x128xbf16>
    %c0_4 = arith.constant 0 : index
    %c0_5 = arith.constant 0 : index
    %5 = vector.load %arg4[%c0_4, %c0_5] : memref<128x128xbf16, #tpu.memory_space<vmem>>, vector<128x128xbf16>
    %cst = arith.constant dense<0.000000e+00> : vector<1024x128xf32>
    %6 = tpu.matmul %4, %5, %cst {dimension_numbers = #tpu.dot_dimension_numbers<[1], [0], [0], [1], [0, 0, 1, 1], [], []>} : vector<1024x128xbf16>, vector<128x128xbf16>, vector<1024x128xf32> -> vector<1024x128xf32>
    %7 = arith.addf %3, %6 : vector<1024x128xf32>
    %c0_6 = arith.constant 0 : index
    %c0_7 = arith.constant 0 : index
    %8 = vector.load %arg7[%c0_6, %c0_7] : memref<1024x128xf32, #tpu.memory_space<vmem>>, vector<1024x128xf32>
    tpu.vector_store %arg7[%c0_6, %c0_7], %7 {strides = array<i32>} : memref<1024x128xf32, #tpu.memory_space<vmem>>, vector<1024x128xf32>,
    %c0_i32_8 = arith.constant 0 : i32
    %9 = arith.cmpi eq, %arg2, %c0_i32_8 : i32
    %10 = arith.extui %9 : i1 to i32
    %c0_i32_9 = arith.constant 0 : i32
    %11 = arith.cmpi ne, %10, %c0_i32_9 : i32
    scf.if %11 {
      %c0_10 = arith.constant 0 : index
      %c0_11 = arith.constant 0 : index
      %12 = vector.load %arg7[%c0_10, %c0_11] : memref<1024x128xf32, #tpu.memory_space<vmem>>, vector<1024x128xf32>
      %13 = arith.truncf %12 : vector<1024x128xf32> to vector<1024x128xbf16>
      %c0_12 = arith.constant 0 : index
      %c0_13 = arith.constant 0 : index
      %14 = vector.load %arg5[%c0_12, %c0_13] : memref<1024x128xbf16, #tpu.memory_space<vmem>>, vector<1024x128xbf16>
      tpu.vector_store %arg5[%c0_12, %c0_13], %13 {strides = array<i32>} : memref<1024x128xbf16, #tpu.memory_space<vmem>>, vector<1024x128xbf16>,
      %cst_14 = arith.constant dense<0.000000e+00> : vector<128xf32>
      %15 = vector.multi_reduction <add>, %12, %cst_14 [0] : vector<1024x128xf32> to vector<128xf32>
      %16 = vector.shape_cast %15 : vector<128xf32> to vector<1x128xf32>
      %17 = arith.mulf %12, %12 : vector<1024x128xf32>
      %cst_15 = arith.constant dense<0.000000e+00> : vector<128xf32>
      %18 = vector.multi_reduction <add>, %17, %cst_15 [0] : vector<1024x128xf32> to vector<128xf32>
      %19 = vector.shape_cast %18 : vector<128xf32> to vector<1x128xf32>
      %20 = tpu.iota {dimensions = array<i32: 0>} : vector<8x128xi32>
      %c0_i32_16 = arith.constant 0 : i32
      %21 = vector.broadcast %c0_i32_16 : i32 to vector<8x128xi32>
      %22 = arith.cmpi eq, %20, %21 : vector<8x128xi32>
      %cst_17 = arith.constant 0.000000e+00 : f32
      %23 = vector.shape_cast %16 : vector<1x128xf32> to vector<1x128xf32>
      %24 = vector.broadcast %23 : vector<1x128xf32> to vector<8x128xf32>
      %25 = vector.broadcast %cst_17 : f32 to vector<8x128xf32>
      %26 = arith.select %22, %24, %25 : vector<8x128xi1>, vector<8x128xf32>
      %c1_i32 = arith.constant 1 : i32
      %27 = vector.broadcast %c1_i32 : i32 to vector<8x128xi32>
      %28 = arith.cmpi eq, %20, %27 : vector<8x128xi32>
      %cst_18 = arith.constant 0.000000e+00 : f32
      %29 = vector.shape_cast %19 : vector<1x128xf32> to vector<1x128xf32>
      %30 = vector.broadcast %29 : vector<1x128xf32> to vector<8x128xf32>
      %31 = vector.broadcast %cst_18 : f32 to vector<8x128xf32>
      %32 = arith.select %28, %30, %31 : vector<8x128xi1>, vector<8x128xf32>
      %33 = arith.addf %26, %32 : vector<8x128xf32>
      %34 = vector.shape_cast %33 : vector<8x128xf32> to vector<1x8x128xf32>
      %c0_19 = arith.constant 0 : index
      %c0_20 = arith.constant 0 : index
      %c0_21 = arith.constant 0 : index
      %35 = vector.load %arg6[%c0_19, %c0_20, %c0_21] : memref<1x8x128xf32, #tpu.memory_space<vmem>>, vector<1x8x128xf32>
      tpu.vector_store %arg6[%c0_19, %c0_20, %c0_21], %34 {strides = array<i32>} : memref<1x8x128xf32, #tpu.memory_space<vmem>>, vector<1x8x128xf32>,
    } else {
    }
    return
  }
  func.func @transform_0(%arg0: i32, %arg1: i32, %arg2: i32) -> (i32, i32) {
    %c0_i32 = arith.constant 0 : i32
    return %arg0, %arg2 : i32, i32
  }
  func.func @transform_1(%arg0: i32, %arg1: i32, %arg2: i32) -> (i32, i32) {
    %c0_i32 = arith.constant 0 : i32
    return %arg2, %arg1 : i32, i32
  }
  func.func @transform_2(%arg0: i32, %arg1: i32, %arg2: i32) -> (i32, i32) {
    %c0_i32 = arith.constant 0 : i32
    return %arg0, %arg1 : i32, i32
  }
  func.func @transform_3(%arg0: i32, %arg1: i32, %arg2: i32) -> (i32, i32, i32) {
    %c0_i32 = arith.constant 0 : i32
    %c0_i32_0 = arith.constant 0 : i32
    return %arg0, %c0_i32, %arg1 : i32, i32, i32
  }
}

</mosaic_0001>

<bundles_post_ra>
// kernel: _conv_gemm_stats.1
= control target key start
LH: loop header
LB: loop body
LE: loop exit
PB: predicated region body
PF: predicated region fallthrough
CT: control target
= control target key end

     0   :  { %9 = vsyncpa [#allocation4], 0  ;;  %s5337_s0 = inlined_call_operand.hbm [shape: bf16[2048,128], index: 0, kind: input, shape index: {}]   ;;  %s5338_s1 = inlined_call_operand.hbm [shape: bf16[128,128], index: 1, kind: input, shape index: {}]   ;;  %s5339_s2 = inlined_call_operand.hbm [shape: bf16[2048,128], index: 2, kind: output, shape index: {0}]   ;;  %s5340_s3 = inlined_call_operand.hbm [shape: f32[2,8,128], index: 3, kind: output, shape index: {1}]  }
   0x1   :  { %11 = vsyncpa [#allocation4 + $0x1], 0 }
   0x2   :  { %12 = vsyncpa [#allocation7], 0 }
   0x3   :  { %13 = vsyncpa [#allocation5], 0 }
   0x4   :  { %15 = vsyncpa [#allocation5 + $0x1], 0 }
   0x5   :  { %16 = vsyncpa [#allocation10], 0 }
   0x6   :  { %18 = vsyncpa [#allocation10 + $0x1], 0  ;;  %s4560_s12 = smov 0   ;;  %s4562_s13 = smov 0  }
   0x7   :  { %s4564_s14 = smov 0   ;;  %s4566_s15 = smov 0  }
   0x8   :  { %s4568_s16 = smov 0   ;;  %s4570_s17 = smov 0  }
   0x9 LB: > { %s3235_s18 = sadd.s32 4294967295, %s4530_s17   ;;  %s3236_s19 = sadd.s32 4294967294, %s4530_s17   ;;  %s4530_s17 = sphi %s4570_s17, %s24_s17   ;;  %s4526_s16 = sphi %s4568_s16, %s5424_s16   ;;  %s4522_s15 = sphi %s4566_s15, %s5423_s15   ;;  %s4518_s14 = sphi %s4564_s14, %s5422_s14   ;;  %s4514_s13 = sphi %s4562_s13, %s5421_s13   ;;  %s4510_s12 = sphi %s4560_s12, %s5420_s12  }
   0xa   : > { %p65_p0 = scmp.ne.s32.totalorder %s4514_s13, %s4510_s12  ;;  %p4594_p1 = scmp.eq.s32.totalorder %s3235_s18, 0 }
   0xb   : > { %p4598_p2 = scmp.eq.s32.totalorder %s3235_s18, 1  ;;  %p125_p3 = scmp.eq.s32.totalorder %s3236_s19, 1 }
   0xc   : > { %s5375_s20 = scalar_select %p4594_p1, 1, 0 }
   0xd   : > { %s5376_s21 = scalar_select %p4598_p2, 1, 0 }
   0xe   : > { %p4604_p4 = por %p4594_p1, %p65_p0  ;;  %p3237_p5 = scmp.ge.s32.totalorder %s4530_s17, 1 }
   0xf   : > { %p4609_p6 = por %p125_p3, %p65_p0  ;;  %p160_p7 = scmp.lt.s32.totalorder %s4530_s17, 3 }
  0x10   : > { %s5377_s22 = scalar_select %p4604_p4, 1, 0 }
  0x11   : > { %s5378_s23 = scalar_select %p4609_p6, 1, 0 }
  0x12   : > { %p4614_p8 = pnand %p3237_p5, %p160_p7  ;;  %s4532_s25 = smov [#allocation6]  }
  0x13   : > { %s176_s26 = sshll.u32 %s4532_s25, 4  ;;  %s43_s28 = sadd.s32 1, %s4526_s16  ;;  %s177_s26 = int_to_ptr.vmem [resolvable:$true] %s176_s26 }
  0x14   : > { %s5379_s24 = scalar_select %p4614_p8, 1, 0 }
  0x15   : > { %p4210_p9 = pneg %p4614_p8  ;;  %s4354_s4 = scalar_lea.hbm %s5338_s1, 1024 }
  0x16   : > { %p4355_p12 = scmp.ne.s32.totalorder %s5338_s1, %s4354_s4  ;;  %p4361_p5 = scmp.lt.u32.totalorder %s4354_s4, %s5338_s1 }
  0x17   : > { %p4623_p11 = pnand %p4210_p9, %p4594_p1 }
  0x19   : > { %p4356_p13 = pneg %p4623_p11 }
  0x1b   : > { %p4357_p0 = pnand %p4356_p13, %p4355_p12 }
  0x1d   : > { %p4358_p3 = pneg %p4357_p0 }
  0x1f   : > { %p4363_p7 = pnand %p4361_p5, %p4358_p3 }
  0x21   : > { %4366 = shalt.err (!%p4363_p7)
}
  0x22   : > { %s4367_s9 = scalar_lea.vmem %s177_s26, 1024  ;;  %p4375_p1 = scmp.lt.s32.totalorder %s177_s26, %s177_s26 }
  0x23   : > { %p4368_p9 = scmp.ne.s32.totalorder %s177_s26, %s4367_s9  ;;  %p4376_p4 = scmp.lt.s32.totalorder %s4367_s9, %s4367_s9 }
  0x25   : > { %p4370_p10 = pnand %p4368_p9, %p4356_p13  ;;  %p4377_p8 = por %p4376_p4, %p4375_p1 }
  0x27   : > { %p4371_p6 = pneg %p4370_p10 }
  0x29   : > { %p4378_p2 = pnand %p4377_p8, %p4371_p6 }
  0x2b   : > { %4381 = shalt.err (!%p4378_p2)
}
  0x2c   : > { %s4533_s10 = smov 64   ;;  %s4534_s11 = smov 4  }
  0x2d   : > { %4213 = dma.hbm_to_vmem [thread:$0]  (!%p4623_p11), %s5338_s1, 1024, %s177_s26, [#allocation7], %s4533_s10, %s4533_s10, %s4534_s11  }
  0x2e   : > { %p45_p1 = scmp.ge.s32.totalorder %s43_s28, 2  ;;  %s52_s25 = sadd.s32 1, %s4518_s14 }
  0x2f   : > { %p59_p2 = scmp.ne.s32.totalorder %s4518_s14, %s4514_s13  ;;  %p60_p4 = scmp.eq.s32.totalorder %s4530_s17, 0 }
  0x30   : > { %s5426_s28 = smov (%p45_p1, %s43_s28), 0  ;;  %p5382_p8 = scmp.ne.s32.totalorder %s5376_s21, 0 }
  0x31   : > { %p4653_p6 = por %p60_p4, %p59_p2  ;;  %s47_s30 = ssub.s32 %s4526_s16, %s5426_s28 }
  0x32   : > { %p4659_p10 = por %p5382_p8, %p59_p2  ;;  %p4226_p12 = scmp.lt.s32.totalorder %s4530_s17, 2 }
  0x33   : > { %p50_p11 = scmp.eq.s32.totalorder %s47_s30, 0  ;;  %s190_s26 = sand.u32 1, %s4518_s14  }
  0x34   : > { %s3240_s4 = sshll.u32 %s190_s26, 9  ;;  %s3455_s6 = sshll.u32 %s4526_s16, 13 }
  0x35   : > { %s4668_s5 = scalar_select %p50_p11, %s4518_s14, %s52_s25  }
  0x36   : > { %s4674_s9 = scalar_lea.hbm %s5337_s0, %s3455_s6  ;;  %s194_s21 = scalar_lea.vmem [#allocation3], %s3240_s4 }
  0x37   : > { %s202_s18 = sshll.u32 %s194_s21, 4  ;;  %p4680_p13 = pnand %p4226_p12, %p4653_p6  ;;  %s4676_s18 = int_to_ptr.vmem [resolvable:$true] %s202_s18 }
  0x38   : > { %s4684_s25 = scalar_lea.sflag [#allocation4], %s190_s26  ;;  %s4382_s30 = scalar_lea.hbm %s4674_s9, 8192 }
  0x39   : > { %p4383_p0 = scmp.ne.s32.totalorder %s4674_s9, %s4382_s30  ;;  %p4384_p3 = pneg %p4680_p13 }
  0x3a   : > { %s4387_s29 = scalar_lea.hbm %s5337_s0, 16384  ;;  %p4388_p9 = scmp.lt.u32.totalorder %s4674_s9, %s5337_s0 }
  0x3b   : > { %p4385_p5 = pnand %p4384_p3, %p4383_p0  ;;  %p4389_p1 = scmp.lt.u32.totalorder %s4387_s29, %s4382_s30 }
  0x3c   : > { %p4391_p4 = scmp.lt.u32.totalorder %s4382_s30, %s4674_s9 }
  0x3d   : > { %p4386_p7 = pneg %p4385_p5  ;;  %p4390_p2 = por %p4389_p1, %p4388_p9 }
  0x3f   : > { %p4392_p6 = por %p4391_p4, %p4390_p2 }
  0x41   : > { %p4393_p8 = pnand %p4392_p6, %p4386_p7 }
  0x43   : > { %4396 = shalt.err (!%p4393_p8)
}
  0x44   : > { %s4397_s26 = scalar_lea.vmem %s4676_s18, 8192  ;;  %s4535_s21 = smov [#allocation3]  }
  0x45   : > { %p4398_p12 = scmp.ne.s32.totalorder %s4676_s18, %s4397_s26  ;;  %s4402_s4 = sshll.u32 %s4535_s21, 4  ;;  %s4403_s4 = int_to_ptr.vmem [resolvable:$false] %s4402_s4 }
  0x46   : > { %s4404_s6 = scalar_lea.vmem %s4403_s4, 16384  ;;  %p4405_p5 = scmp.lt.s32.totalorder %s4676_s18, %s4403_s4 }
  0x47   : > { %p4400_p11 = pnand %p4398_p12, %p4384_p3  ;;  %p4406_p9 = scmp.lt.s32.totalorder %s4404_s6, %s4397_s26 }
  0x49   : > { %p4401_p0 = pneg %p4400_p11  ;;  %p4407_p1 = por %p4406_p9, %p4405_p5 }
  0x4b   : > { %p4408_p2 = pnand %p4407_p1, %p4401_p0 }
  0x4d   : > { %4411 = shalt.err (!%p4408_p2)
}
  0x4e   : > { %4217 = dma.hbm_to_vmem [thread:$0]  (!%p4680_p13), %s4674_s9, 8192, %s4676_s18, %s4684_s25, %s4533_s10, %s4533_s10, %s4534_s11  }
  0x4f   : > { %p5385_p3 = scmp.ne.s32.totalorder %s5379_s24, 0 }
  0x51   : > { %214 = sbr.rel (%p5385_p3) target bundleno = 639 (0x27f), region = 28 }
  0x58   : > { %s4718_s30 = sand.u32 1, %s4514_s13   ;;  %p5386_p7 = scmp.ne.s32.totalorder %s5377_s22, 0 }
  0x59   : > { %s3244_s29 = sshll.u32 %s4718_s30, 9  ;;  %s217_s7 = scalar_lea.sflag [#allocation4], %s4718_s30 }
  0x5a   : > { %s4724_s19 = scalar_lea.vmem [#allocation3], %s3244_s29 }
  0x5b   : > { %4493 = dma.done.wait (%p5386_p7), %s217_s7, 8192  }
  0x5c   : > { %4495 = vsyncadd (%p5386_p7), %s217_s7, 4294959104  ;;  %p5387_p13 = scmp.ne.s32.totalorder %s5375_s20, 0 }
  0x5e   : > { %4497 = dma.done.wait (%p5387_p13), [#allocation7], 1024  }
  0x5f   : > { %4499 = vsyncadd (%p5387_p13), [#allocation7], 4294966272  ;;  %v4282_v0 = vld [vmem:[#allocation6] sm:$0xff]   ;;  %v4283_v1 = vld [vmem:[#allocation6 + $0x8] sm:$0xff]   ;;  %s4800_s20 = scalar_lea.vmem [#allocation8], %s3244_s29  ;;  %s3584_s22 = sshll.u32 %s4522_s15, 13 }
  0x60   : > { %4040 = vmatprep.subr.bf16.mxu0 %v4282_v0  ;;  %4184 = vmatprep.subr.bf16.mxu1 %v4282_v0  ;;  %v4284_v2 = vld [vmem:[#allocation6 + $0x10] sm:$0xff]   ;;  %v4285_v3 = vld [vmem:[#allocation6 + $0x18] sm:$0xff]   ;;  %v4290_v4 = vld [vmem:[%s4724_s19] sm:$0xff]   ;;  %s5080_s11 = scalar_lea.hbm %s5339_s2, %s3584_s22  ;;  %s3086_s9 = sshll.u32 %s4800_s20, 4  ;;  %s5086_s9 = int_to_ptr.vmem [resolvable:$true] %s3086_s9 }
  0x61   : > { %4041 = vmatpush3.bf16.msra.mxu0 %v4282_v0  ;;  %4192 = vmatpush3.bf16.msra.mxu1 %v4282_v0  ;;  %v4286_v5 = vld [vmem:[#allocation6 + $0x20] sm:$0xff]   ;;  %v4287_v6 = vld [vmem:[#allocation6 + $0x28] sm:$0xff]   ;;  %v4288_v7 = vld [vmem:[#allocation6 + $0x30] sm:$0xff]   ;;  %s3067_s18 = scalar_lea.sflag [#allocation5], %s4718_s30  ;;  %s4412_s25 = scalar_lea.vmem %s5086_s9, 8192 }
  0x62   : > { %4042 = vmatprep.subr.bf16.mxu0 %v4283_v1  ;;  %4185 = vmatprep.subr.bf16.mxu1 %v4283_v1  ;;  %v4289_v8 = vld [vmem:[#allocation6 + $0x38] sm:$0xff]   ;;  %v4291_v9 = vld [vmem:[%s4724_s19 + $0x8] sm:$0xff]   ;;  %v4292_v10 = vld [vmem:[%s4724_s19 + $0x10] sm:$0xff]   ;;  %p4413_p4 = scmp.ne.s32.totalorder %s5086_s9, %s4412_s25  ;;  %s4536_s8 = smov [#allocation8]  }
  0x63   : > { %4056 = vmatprep.mubr.bf16.mxu0 %v4290_v4  ;;  %v4293_v11 = vld [vmem:[%s4724_s19 + $0x18] sm:$0xff]   ;;  %v4294_v12 = vld [vmem:[%s4724_s19 + $0x20] sm:$0xff]   ;;  %v4323_v14 = vld [vmem:[%s4724_s19 + $0x108] sm:$0xff]   ;;  %s4416_s26 = sshll.u32 %s4536_s8, 4  ;;  %s4417_s26 = int_to_ptr.vmem [resolvable:$false] %s4416_s26 }
  0x64   : > { %v4322_v13 = vld [vmem:[%s4724_s19 + $0x100] sm:$0xff]   ;;  %v4324_v15 = vld [vmem:[%s4724_s19 + $0x110] sm:$0xff]   ;;  %v4295_v16 = vld [vmem:[%s4724_s19 + $0x28] sm:$0xff]   ;;  %p4414_p6 = pnand %p4413_p4, %p4659_p10  ;;  %s4418_s21 = scalar_lea.vmem %s4417_s26, 16384 }
  0x65   : > { %4043 = vmatpush3.bf16.msra.mxu0 %v4283_v1  ;;  %4193 = vmatpush3.bf16.msra.mxu1 %v4283_v1  ;;  %v4296_v17 = vld [vmem:[%s4724_s19 + $0x30] sm:$0xff]   ;;  %v4325_v18 = vld [vmem:[%s4724_s19 + $0x118] sm:$0xff]   ;;  %v4326_v19 = vld [vmem:[%s4724_s19 + $0x120] sm:$0xff]   ;;  %p4419_p12 = scmp.lt.s32.totalorder %s5086_s9, %s4417_s26  ;;  %p4420_p11 = scmp.lt.s32.totalorder %s4418_s21, %s4412_s25 }
  0x66   : > { %4044 = vmatprep.subr.bf16.mxu0 %v4284_v2  ;;  %4186 = vmatprep.subr.bf16.mxu1 %v4284_v2  ;;  %v4297_v20 = vld [vmem:[%s4724_s19 + $0x38] sm:$0xff]   ;;  %v4298_v21 = vld [vmem:[%s4724_s19 + $0x40] sm:$0xff]   ;;  %v4327_v22 = vld [vmem:[%s4724_s19 + $0x128] sm:$0xff]   ;;  %p4415_p8 = pneg %p4414_p6 }
  0x67   : > { %4120 = vmatprep.mubr.bf16.mxu1 %v4322_v13  ;;  %v4328_v23 = vld [vmem:[%s4724_s19 + $0x130] sm:$0xff]   ;;  %v4299_v24 = vld [vmem:[%s4724_s19 + $0x48] sm:$0xff]   ;;  %v4329_v26 = vld [vmem:[%s4724_s19 + $0x138] sm:$0xff]   ;;  %p4421_p0 = por %p4420_p11, %p4419_p12 }
  0x68   : > { %v4300_v25 = vld [vmem:[%s4724_s19 + $0x50] sm:$0xff]   ;;  %v4330_v27 = vld [vmem:[%s4724_s19 + $0x140] sm:$0xff]   ;;  %v4301_v28 = vld [vmem:[%s4724_s19 + $0x58] sm:$0xff]  }
  0x69   : > { %4045 = vmatpush3.bf16.msra.mxu0 %v4284_v2  ;;  %4194 = vmatpush3.bf16.msra.mxu1 %v4284_v2  ;;  %v4302_v29 = vld [vmem:[%s4724_s19 + $0x60] sm:$0xff]   ;;  %v4331_v30 = vld [vmem:[%s4724_s19 + $0x148] sm:$0xff]   ;;  %v4332_v31 = vld [vmem:[%s4724_s19 + $0x150] sm:$0xff]   ;;  %p4422_p5 = pnand %p4421_p0, %p4415_p8 }
  0x6a   : > { %4046 = vmatprep.subr.bf16.mxu0 %v4285_v3  ;;  %4187 = vmatprep.subr.bf16.mxu1 %v4285_v3  ;;  %v4303_v32 = vld [vmem:[%s4724_s19 + $0x68] sm:$0xff]   ;;  %v4304_v33 = vld [vmem:[%s4724_s19 + $0x70] sm:$0xff]   ;;  %v4333_v34 = vld [vmem:[%s4724_s19 + $0x158] sm:$0xff]  }
  0x6b   : > { %v4334_v35 = vld [vmem:[%s4724_s19 + $0x160] sm:$0xff]   ;;  %v4305_v36 = vld [vmem:[%s4724_s19 + $0x78] sm:$0xff]   ;;  %v4335_v38 = vld [vmem:[%s4724_s19 + $0x168] sm:$0xff]  }
  0x6c   : > { %v4306_v37 = vld [vmem:[%s4724_s19 + $0x80] sm:$0xff]   ;;  %v4336_v39 = vld [vmem:[%s4724_s19 + $0x170] sm:$0xff]   ;;  %v4307_v40 = vld [vmem:[%s4724_s19 + $0x88] sm:$0xff]  }
  0x6d   : > { %4047 = vmatpush3.bf16.msra.mxu0 %v4285_v3  ;;  %4195 = vmatpush3.bf16.msra.mxu1 %v4285_v3  ;;  %v4308_v41 = vld [vmem:[%s4724_s19 + $0x90] sm:$0xff]   ;;  %v4337_v42 = vld [vmem:[%s4724_s19 + $0x178] sm:$0xff]   ;;  %v4338_v43 = vld [vmem:[%s4724_s19 + $0x180] sm:$0xff]  }
  0x6e   : > { %4048 = vmatprep.subr.bf16.mxu0 %v4286_v5  ;;  %4188 = vmatprep.subr.bf16.mxu1 %v4286_v5  ;;  %v4309_v44 = vld [vmem:[%s4724_s19 + $0x98] sm:$0xff]   ;;  %v4310_v45 = vld [vmem:[%s4724_s19 + $0xa0] sm:$0xff]   ;;  %v4339_v46 = vld [vmem:[%s4724_s19 + $0x188] sm:$0xff]  }
  0x6f   : > { %v4340_v47 = vld [vmem:[%s4724_s19 + $0x190] sm:$0xff]   ;;  %v4311_v48 = vld [vmem:[%s4724_s19 + $0xa8] sm:$0xff]   ;;  %v4341_v50 = vld [vmem:[%s4724_s19 + $0x198] sm:$0xff]  }
  0x70   : > { %v4312_v49 = vld [vmem:[%s4724_s19 + $0xb0] sm:$0xff]   ;;  %v4342_v51 = vld [vmem:[%s4724_s19 + $0x1a0] sm:$0xff]   ;;  %v4313_v52 = vld [vmem:[%s4724_s19 + $0xb8] sm:$0xff]  }
  0x71   : > { %4049 = vmatpush3.bf16.msra.mxu0 %v4286_v5  ;;  %4196 = vmatpush3.bf16.msra.mxu1 %v4286_v5  ;;  %v4314_v53 = vld [vmem:[%s4724_s19 + $0xc0] sm:$0xff]   ;;  %v4343_v54 = vld [vmem:[%s4724_s19 + $0x1a8] sm:$0xff]   ;;  %v4344_v55 = vld [vmem:[%s4724_s19 + $0x1b0] sm:$0xff]  }
  0x72   : > { %4050 = vmatprep.subr.bf16.mxu0 %v4287_v6  ;;  %4189 = vmatprep.subr.bf16.mxu1 %v4287_v6  ;;  %v4315_v56 = vld [vmem:[%s4724_s19 + $0xc8] sm:$0xff]   ;;  %v4316_v57 = vld [vmem:[%s4724_s19 + $0xd0] sm:$0xff]   ;;  %v4345_v58 = vld [vmem:[%s4724_s19 + $0x1b8] sm:$0xff]  }
  0x73   : > { %v4346_v59 = vld [vmem:[%s4724_s19 + $0x1c0] sm:$0xff]   ;;  %v4317_v60 = vld [vmem:[%s4724_s19 + $0xd8] sm:$0xff]   ;;  %v4347_v62 = vld [vmem:[%s4724_s19 + $0x1c8] sm:$0xff]  }
  0x74   : > { %v4318_v61 = vld [vmem:[%s4724_s19 + $0xe0] sm:$0xff]   ;;  %v4348_v63 = vld [vmem:[%s4724_s19 + $0x1d0] sm:$0xff]   ;;  %v4319_v0 = vld [vmem:[%s4724_s19 + $0xe8] sm:$0xff]  }
  0x75   : > { %4051 = vmatpush3.bf16.msra.mxu0 %v4287_v6  ;;  %4197 = vmatpush3.bf16.msra.mxu1 %v4287_v6  ;;  %v4320_v1 = vld [vmem:[%s4724_s19 + $0xf0] sm:$0xff]   ;;  %v4349_v2 = vld [vmem:[%s4724_s19 + $0x1d8] sm:$0xff]   ;;  %v4350_v3 = vld [vmem:[%s4724_s19 + $0x1e0] sm:$0xff]  }
  0x76   : > { %4052 = vmatprep.subr.bf16.mxu0 %v4288_v7  ;;  %4190 = vmatprep.subr.bf16.mxu1 %v4288_v7  ;;  %v4321_v4 = vld [vmem:[%s4724_s19 + $0xf8] sm:$0xff]   ;;  %v4351_v5 = vld [vmem:[%s4724_s19 + $0x1e8] sm:$0xff]   ;;  %v4352_v6 = vld [vmem:[%s4724_s19 + $0x1f0] sm:$0xff]  }
  0x79   : > { %4053 = vmatpush3.bf16.msra.mxu0 %v4288_v7  ;;  %4198 = vmatpush3.bf16.msra.mxu1 %v4288_v7  ;;  %v4353_v7 = vld [vmem:[%s4724_s19 + $0x1f8] sm:$0xff]  }
  0x7a   : > { %4054 = vmatprep.subr.bf16.mxu0 %v4289_v8  ;;  %4191 = vmatprep.subr.bf16.mxu1 %v4289_v8 }
  0x7d   : > { %4055 = vmatpush3.bf16.msra.mxu0 %v4289_v8  ;;  %4199 = vmatpush3.bf16.msra.mxu1 %v4289_v8 }
  0x80   : > { %4057 = vmatmul.mubr.bf16.vlgmr.msra.gmra.mrb[0].mxu0 %v4291_v9  ;;  %4121 = vmatmul.mubr.bf16.vlgmr.msra.gmra.mrb[0].mxu1 %v4323_v14 }
  0x81   : > { %4060 = vmatprep.mubr.bf16.mxu0 %v4292_v10  ;;  %4124 = vmatprep.mubr.bf16.mxu1 %v4324_v15 }
  0x88   : > { %4061 = vmatmul.mubr.bf16.gmra.mrb[4].mxu0 %v4293_v11  ;;  %4125 = vmatmul.mubr.bf16.gmra.mrb[4].mxu1 %v4325_v18 }
  0x89   : > { %4064 = vmatprep.mubr.bf16.mxu0 %v4294_v12  ;;  %4128 = vmatprep.mubr.bf16.mxu1 %v4326_v19 }
  0x90   : > { %4065 = vmatmul.mubr.bf16.gmra.mrb[8].mxu0 %v4295_v16  ;;  %4129 = vmatmul.mubr.bf16.gmra.mrb[8].mxu1 %v4327_v22 }
  0x91   : > { %4068 = vmatprep.mubr.bf16.mxu0 %v4296_v17  ;;  %4132 = vmatprep.mubr.bf16.mxu1 %v4328_v23 }
  0x98   : > { %4069 = vmatmul.mubr.bf16.gmra.mrb[12].mxu0 %v4297_v20  ;;  %4133 = vmatmul.mubr.bf16.gmra.mrb[12].mxu1 %v4329_v26 }
  0x99   : > { %4072 = vmatprep.mubr.bf16.mxu0 %v4298_v21  ;;  %4136 = vmatprep.mubr.bf16.mxu1 %v4330_v27 }
  0xa0   : > { %4073 = vmatmul.mubr.bf16.gmra.mrb[16].mxu0 %v4299_v24  ;;  %4137 = vmatmul.mubr.bf16.gmra.mrb[16].mxu1 %v4331_v30 }
  0xa1   : > { %4076 = vmatprep.mubr.bf16.mxu0 %v4300_v25  ;;  %4140 = vmatprep.mubr.bf16.mxu1 %v4332_v31 }
  0xa8   : > { %4077 = vmatmul.mubr.bf16.gmra.mrb[20].mxu0 %v4301_v28  ;;  %4141 = vmatmul.mubr.bf16.gmra.mrb[20].mxu1 %v4333_v34 }
  0xa9   : > { %4080 = vmatprep.mubr.bf16.mxu0 %v4302_v29  ;;  %4144 = vmatprep.mubr.bf16.mxu1 %v4334_v35 }
  0xb0   : > { %4081 = vmatmul.mubr.bf16.gmra.mrb[24].mxu0 %v4303_v32  ;;  %4145 = vmatmul.mubr.bf16.gmra.mrb[24].mxu1 %v4335_v38 }
  0xb1   : > { %4084 = vmatprep.mubr.bf16.mxu0 %v4304_v33  ;;  %4148 = vmatprep.mubr.bf16.mxu1 %v4336_v39 }
  0xb8   : > { %4085 = vmatmul.mubr.bf16.gmra.mrb[28].mxu0 %v4305_v36  ;;  %4149 = vmatmul.mubr.bf16.gmra.mrb[28].mxu1 %v4337_v42 }
  0xb9   : > { %4088 = vmatprep.mubr.bf16.mxu0 %v4306_v37  ;;  %4152 = vmatprep.mubr.bf16.mxu1 %v4338_v43 }
  0xc0   : > { %4089 = vmatmul.mubr.bf16.gmra.mrb[32].mxu0 %v4307_v40  ;;  %4153 = vmatmul.mubr.bf16.gmra.mrb[32].mxu1 %v4339_v46 }
  0xc1   : > { %4092 = vmatprep.mubr.bf16.mxu0 %v4308_v41  ;;  %4156 = vmatprep.mubr.bf16.mxu1 %v4340_v47 }
  0xc8   : > { %4093 = vmatmul.mubr.bf16.gmra.mrb[36].mxu0 %v4309_v44  ;;  %4157 = vmatmul.mubr.bf16.gmra.mrb[36].mxu1 %v4341_v50 }
  0xc9   : > { %4096 = vmatprep.mubr.bf16.mxu0 %v4310_v45  ;;  %4160 = vmatprep.mubr.bf16.mxu1 %v4342_v51 }
  0xd0   : > { %4097 = vmatmul.mubr.bf16.gmra.mrb[40].mxu0 %v4311_v48  ;;  %4161 = vmatmul.mubr.bf16.gmra.mrb[40].mxu1 %v4343_v54 }
  0xd1   : > { %4100 = vmatprep.mubr.bf16.mxu0 %v4312_v49  ;;  %4164 = vmatprep.mubr.bf16.mxu1 %v4344_v55 }
  0xd8   : > { %4101 = vmatmul.mubr.bf16.gmra.mrb[44].mxu0 %v4313_v52  ;;  %4165 = vmatmul.mubr.bf16.gmra.mrb[44].mxu1 %v4345_v58 }
  0xd9   : > { %4104 = vmatprep.mubr.bf16.mxu0 %v4314_v53  ;;  %4168 = vmatprep.mubr.bf16.mxu1 %v4346_v59 }
  0xe0   : > { %4105 = vmatmul.mubr.bf16.gmra.mrb[48].mxu0 %v4315_v56  ;;  %4169 = vmatmul.mubr.bf16.gmra.mrb[48].mxu1 %v4347_v62 }
  0xe1   : > { %4108 = vmatprep.mubr.bf16.mxu0 %v4316_v57  ;;  %4172 = vmatprep.mubr.bf16.mxu1 %v4348_v63 }
  0xe8   : > { %4109 = vmatmul.mubr.bf16.gmra.mrb[52].mxu0 %v4317_v60  ;;  %4173 = vmatmul.mubr.bf16.gmra.mrb[52].mxu1 %v4349_v2 }
  0xe9   : > { %4112 = vmatprep.mubr.bf16.mxu0 %v4318_v61  ;;  %4176 = vmatprep.mubr.bf16.mxu1 %v4350_v3 }
  0xf0   : > { %4113 = vmatmul.mubr.bf16.gmra.mrb[56].mxu0 %v4319_v0  ;;  %4177 = vmatmul.mubr.bf16.gmra.mrb[56].mxu1 %v4351_v5 }
  0xf1   : > { %4116 = vmatprep.mubr.bf16.mxu0 %v4320_v1  ;;  %4180 = vmatprep.mubr.bf16.mxu1 %v4352_v6 }
  0xf8   : > { %4117 = vmatmul.mubr.bf16.gmra.mrb[60].mxu0 %v4321_v4  ;;  %4181 = vmatmul.mubr.bf16.gmra.mrb[60].mxu1 %v4353_v7 }
 0x153   : > { %v4058_v8 = vpop.f32.mrb[0].mxu0  ;;  %v4804_v25 = vpop.f32.mrb[0].mxu1 }
 0x154   : > { %v1126_v9 = vpop.f32.mrb[1].mxu0  ;;  %v2799_v17 = vmul.f32 %v4058_v8, %v4058_v8  ;;  %v4806_v30 = vpop.f32.mrb[1].mxu1 }
 0x155   : > { %v4059_v10 = vpop.f32.mrb[2].mxu0  ;;  %v2797_v13 = vmul.f32 %v1126_v9, %v1126_v9  ;;  %v4808_v33 = vpop.f32.mrb[2].mxu1 }
 0x156   : > { %v3593_v11 = vpack.c.bf16 %v4059_v10, %v4058_v8  ;;  %v1129_v12 = vpop.f32.mrb[3].mxu0  ;;  %v2800_v20 = vmul.f32 %v4059_v10, %v4059_v10  ;;  %v4810_v38 = vpop.f32.mrb[3].mxu1  ;;  %v3753_v39 = vpack.c.bf16 %v4808_v33, %v4804_v25 }
 0x157   : > { %v3588_v14 = vpack.c.bf16 %v1129_v12, %v1126_v9  ;;  %v2664_v15 = vadd.f32 %v1129_v12, %v1126_v9  ;;  %v2798_v16 = vmul.f32 %v1129_v12, %v1129_v12  ;;  %v3748_v40 = vpack.c.bf16 %v4810_v38, %v4806_v30 }
 0x158   : > { %3905 = vst [vmem:[%s4800_s20 + $0x8] sm:$0xff] %v3593_v11   ;;  %3937 = vst [vmem:[%s4800_s20 + $0x108] sm:$0xff] %v3753_v39  }
 0x159   : > { %3589 = vst [vmem:[%s4800_s20] sm:$0xff] %v3588_v14   ;;  %v2665_v18 = vadd.f32 %v4058_v8, %v2664_v15  ;;  %v2925_v19 = vadd.f32 %v2798_v16, %v2797_v13  ;;  %3936 = vst [vmem:[%s4800_s20 + $0x100] sm:$0xff] %v3748_v40  }
 0x15b   : > { %v2666_v21 = vadd.f32 %v4059_v10, %v2665_v18  ;;  %v2926_v22 = vadd.f32 %v2925_v19, %v2799_v17  ;;  %v4062_v23 = vpop.f32.mrb[4].mxu0  ;;  %v4820_v49 = vpop.f32.mrb[4].mxu1 }
 0x15c   : > { %v1142_v24 = vpop.f32.mrb[5].mxu0  ;;  %v2803_v41 = vmul.f32 %v4062_v23, %v4062_v23  ;;  %v4822_v54 = vpop.f32.mrb[5].mxu1 }
 0x15d   : > { %v2927_v26 = vadd.f32 %v2926_v22, %v2800_v20  ;;  %v2667_v27 = vadd.f32 %v2666_v21, %v1142_v24  ;;  %v2801_v28 = vmul.f32 %v1142_v24, %v1142_v24  ;;  %v4063_v29 = vpop.f32.mrb[6].mxu0  ;;  %v4824_v57 = vpop.f32.mrb[6].mxu1 }
 0x15e   : > { %v3603_v31 = vpack.c.bf16 %v4063_v29, %v4062_v23  ;;  %v1145_v32 = vpop.f32.mrb[7].mxu0  ;;  %v2804_v44 = vmul.f32 %v4063_v29, %v4063_v29  ;;  %v4826_v62 = vpop.f32.mrb[7].mxu1  ;;  %v3763_v63 = vpack.c.bf16 %v4824_v57, %v4820_v49 }
 0x15f   : > { %v2928_v34 = vadd.f32 %v2927_v26, %v2801_v28  ;;  %v3598_v35 = vpack.c.bf16 %v1145_v32, %v1142_v24  ;;  %v2668_v36 = vadd.f32 %v2667_v27, %v1145_v32  ;;  %v2802_v37 = vmul.f32 %v1145_v32, %v1145_v32 }
 0x160   : > { %3907 = vst [vmem:[%s4800_s20 + $0x18] sm:$0xff] %v3603_v31   ;;  %v3758_v0 = vpack.c.bf16 %v4826_v62, %v4822_v54  ;;  %3939 = vst [vmem:[%s4800_s20 + $0x118] sm:$0xff] %v3763_v63  }
 0x161   : > { %3906 = vst [vmem:[%s4800_s20 + $0x10] sm:$0xff] %v3598_v35   ;;  %v2669_v42 = vadd.f32 %v4062_v23, %v2668_v36  ;;  %v2929_v43 = vadd.f32 %v2928_v34, %v2802_v37 }
 0x162   : > { %3938 = vst [vmem:[%s4800_s20 + $0x110] sm:$0xff] %v3758_v0  }
 0x163   : > { %v2930_v45 = vadd.f32 %v2929_v43, %v2803_v41  ;;  %v4066_v46 = vpop.f32.mrb[8].mxu0  ;;  %v2670_v47 = vadd.f32 %v4063_v29, %v2669_v42  ;;  %v4836_v9 = vpop.f32.mrb[8].mxu1 }
 0x164   : > { %v1158_v48 = vpop.f32.mrb[9].mxu0  ;;  %v2807_v1 = vmul.f32 %v4066_v46, %v4066_v46  ;;  %v4838_v14 = vpop.f32.mrb[9].mxu1 }
 0x165   : > { %v2671_v50 = vadd.f32 %v2670_v47, %v1158_v48  ;;  %v2805_v51 = vmul.f32 %v1158_v48, %v1158_v48  ;;  %v2931_v52 = vadd.f32 %v2930_v45, %v2804_v44  ;;  %v4067_v53 = vpop.f32.mrb[10].mxu0  ;;  %v4840_v17 = vpop.f32.mrb[10].mxu1 }
 0x166   : > { %v3613_v55 = vpack.c.bf16 %v4067_v53, %v4066_v46  ;;  %v1161_v56 = vpop.f32.mrb[11].mxu0  ;;  %v2808_v4 = vmul.f32 %v4067_v53, %v4067_v53  ;;  %v4842_v22 = vpop.f32.mrb[11].mxu1  ;;  %v3773_v23 = vpack.c.bf16 %v4840_v17, %v4836_v9 }
 0x167   : > { %v2932_v58 = vadd.f32 %v2931_v52, %v2805_v51  ;;  %v3608_v59 = vpack.c.bf16 %v1161_v56, %v1158_v48  ;;  %v2672_v60 = vadd.f32 %v2671_v50, %v1161_v56  ;;  %v2806_v61 = vmul.f32 %v1161_v56, %v1161_v56 }
 0x168   : > { %3909 = vst [vmem:[%s4800_s20 + $0x28] sm:$0xff] %v3613_v55   ;;  %v3768_v24 = vpack.c.bf16 %v4842_v22, %v4838_v14  ;;  %3941 = vst [vmem:[%s4800_s20 + $0x128] sm:$0xff] %v3773_v23  }
 0x169   : > { %3908 = vst [vmem:[%s4800_s20 + $0x20] sm:$0xff] %v3608_v59   ;;  %v2673_v2 = vadd.f32 %v4066_v46, %v2672_v60  ;;  %v2933_v3 = vadd.f32 %v2932_v58, %v2806_v61 }
 0x16a   : > { %3940 = vst [vmem:[%s4800_s20 + $0x120] sm:$0xff] %v3768_v24  }
 0x16b   : > { %v2934_v5 = vadd.f32 %v2933_v3, %v2807_v1  ;;  %v4070_v6 = vpop.f32.mrb[12].mxu0  ;;  %v2674_v7 = vadd.f32 %v4067_v53, %v2673_v2  ;;  %v4852_v36 = vpop.f32.mrb[12].mxu1 }
 0x16c   : > { %v1174_v8 = vpop.f32.mrb[13].mxu0  ;;  %v2811_v26 = vmul.f32 %v4070_v6, %v4070_v6  ;;  %v4854_v42 = vpop.f32.mrb[13].mxu1 }
 0x16d   : > { %v2675_v10 = vadd.f32 %v2674_v7, %v1174_v8  ;;  %v2809_v11 = vmul.f32 %v1174_v8, %v1174_v8  ;;  %v2935_v12 = vadd.f32 %v2934_v5, %v2808_v4  ;;  %v4071_v13 = vpop.f32.mrb[14].mxu0  ;;  %v4856_v45 = vpop.f32.mrb[14].mxu1 }
 0x16e   : > { %v3623_v15 = vpack.c.bf16 %v4071_v13, %v4070_v6  ;;  %v1177_v16 = vpop.f32.mrb[15].mxu0  ;;  %v2812_v29 = vmul.f32 %v4071_v13, %v4071_v13  ;;  %v4858_v51 = vpop.f32.mrb[15].mxu1  ;;  %v3783_v52 = vpack.c.bf16 %v4856_v45, %v4852_v36 }
 0x16f   : > { %v2936_v18 = vadd.f32 %v2935_v12, %v2809_v11  ;;  %v3618_v19 = vpack.c.bf16 %v1177_v16, %v1174_v8  ;;  %v2676_v20 = vadd.f32 %v2675_v10, %v1177_v16  ;;  %v2810_v21 = vmul.f32 %v1177_v16, %v1177_v16 }
 0x170   : > { %3911 = vst [vmem:[%s4800_s20 + $0x38] sm:$0xff] %v3623_v15   ;;  %v3778_v53 = vpack.c.bf16 %v4858_v51, %v4854_v42  ;;  %3943 = vst [vmem:[%s4800_s20 + $0x138] sm:$0xff] %v3783_v52  }
 0x171   : > { %3910 = vst [vmem:[%s4800_s20 + $0x30] sm:$0xff] %v3618_v19   ;;  %v2677_v27 = vadd.f32 %v4070_v6, %v2676_v20  ;;  %v2937_v28 = vadd.f32 %v2936_v18, %v2810_v21 }
 0x172   : > { %3942 = vst [vmem:[%s4800_s20 + $0x130] sm:$0xff] %v3778_v53  }
 0x173   : > { %v2938_v31 = vadd.f32 %v2937_v28, %v2811_v26  ;;  %v4074_v32 = vpop.f32.mrb[16].mxu0  ;;  %v2678_v34 = vadd.f32 %v4071_v13, %v2677_v27  ;;  %v4868_v1 = vpop.f32.mrb[16].mxu1 }
 0x174   : > { %v1190_v35 = vpop.f32.mrb[17].mxu0  ;;  %v2815_v55 = vmul.f32 %v4074_v32, %v4074_v32  ;;  %v4870_v6 = vpop.f32.mrb[17].mxu1 }
 0x175   : > { %v2679_v37 = vadd.f32 %v2678_v34, %v1190_v35  ;;  %v2813_v39 = vmul.f32 %v1190_v35, %v1190_v35  ;;  %v2939_v40 = vadd.f32 %v2938_v31, %v2812_v29  ;;  %v4075_v41 = vpop.f32.mrb[18].mxu0  ;;  %v4872_v10 = vpop.f32.mrb[18].mxu1 }
 0x176   : > { %v3633_v43 = vpack.c.bf16 %v4075_v41, %v4074_v32  ;;  %v1193_v44 = vpop.f32.mrb[19].mxu0  ;;  %v2816_v59 = vmul.f32 %v4075_v41, %v4075_v41  ;;  %v4874_v16 = vpop.f32.mrb[19].mxu1  ;;  %v3793_v18 = vpack.c.bf16 %v4872_v10, %v4868_v1 }
 0x177   : > { %v2940_v46 = vadd.f32 %v2939_v40, %v2813_v39  ;;  %v3628_v47 = vpack.c.bf16 %v1193_v44, %v1190_v35  ;;  %v2680_v48 = vadd.f32 %v2679_v37, %v1193_v44  ;;  %v2814_v50 = vmul.f32 %v1193_v44, %v1193_v44 }
 0x178   : > { %3913 = vst [vmem:[%s4800_s20 + $0x48] sm:$0xff] %v3633_v43   ;;  %v3788_v19 = vpack.c.bf16 %v4874_v16, %v4870_v6  ;;  %3945 = vst [vmem:[%s4800_s20 + $0x148] sm:$0xff] %v3793_v18  }
 0x179   : > { %3912 = vst [vmem:[%s4800_s20 + $0x40] sm:$0xff] %v3628_v47   ;;  %v2681_v56 = vadd.f32 %v4074_v32, %v2680_v48  ;;  %v2941_v58 = vadd.f32 %v2940_v46, %v2814_v50 }
 0x17a   : > { %3944 = vst [vmem:[%s4800_s20 + $0x140] sm:$0xff] %v3788_v19  }
 0x17b   : > { %v2942_v60 = vadd.f32 %v2941_v58, %v2815_v55  ;;  %v4078_v61 = vpop.f32.mrb[20].mxu0  ;;  %v2682_v63 = vadd.f32 %v4075_v41, %v2681_v56  ;;  %v4884_v31 = vpop.f32.mrb[20].mxu1 }
 0x17c   : > { %v1206_v0 = vpop.f32.mrb[21].mxu0  ;;  %v2819_v20 = vmul.f32 %v4078_v61, %v4078_v61  ;;  %v4886_v39 = vpop.f32.mrb[21].mxu1 }
 0x17d   : > { %v2683_v2 = vadd.f32 %v2682_v63, %v1206_v0  ;;  %v2817_v3 = vmul.f32 %v1206_v0, %v1206_v0  ;;  %v2943_v4 = vadd.f32 %v2942_v60, %v2816_v59  ;;  %v4079_v5 = vpop.f32.mrb[22].mxu0  ;;  %v4888_v43 = vpop.f32.mrb[22].mxu1 }
 0x17e   : > { %v3643_v7 = vpack.c.bf16 %v4079_v5, %v4078_v61  ;;  %v1209_v8 = vpop.f32.mrb[23].mxu0  ;;  %v2820_v24 = vmul.f32 %v4079_v5, %v4079_v5  ;;  %v4890_v50 = vpop.f32.mrb[23].mxu1  ;;  %v3803_v52 = vpack.c.bf16 %v4888_v43, %v4884_v31 }
 0x17f   : > { %v2944_v11 = vadd.f32 %v2943_v4, %v2817_v3  ;;  %v3638_v12 = vpack.c.bf16 %v1209_v8, %v1206_v0  ;;  %v2684_v13 = vadd.f32 %v2683_v2, %v1209_v8  ;;  %v2818_v15 = vmul.f32 %v1209_v8, %v1209_v8 }
 0x180   : > { %3915 = vst [vmem:[%s4800_s20 + $0x58] sm:$0xff] %v3643_v7   ;;  %v3798_v53 = vpack.c.bf16 %v4890_v50, %v4886_v39  ;;  %3947 = vst [vmem:[%s4800_s20 + $0x158] sm:$0xff] %v3803_v52  }
 0x181   : > { %3914 = vst [vmem:[%s4800_s20 + $0x50] sm:$0xff] %v3638_v12   ;;  %v2685_v21 = vadd.f32 %v4078_v61, %v2684_v13  ;;  %v2945_v23 = vadd.f32 %v2944_v11, %v2818_v15 }
 0x182   : > { %3946 = vst [vmem:[%s4800_s20 + $0x150] sm:$0xff] %v3798_v53  }
 0x183   : > { %v2946_v26 = vadd.f32 %v2945_v23, %v2819_v20  ;;  %v4082_v27 = vpop.f32.mrb[24].mxu0  ;;  %v2686_v28 = vadd.f32 %v4079_v5, %v2685_v21  ;;  %v4900_v2 = vpop.f32.mrb[24].mxu1 }
 0x184   : > { %v1222_v29 = vpop.f32.mrb[25].mxu0  ;;  %v2823_v55 = vmul.f32 %v4082_v27, %v4082_v27  ;;  %v4902_v8 = vpop.f32.mrb[25].mxu1 }
 0x185   : > { %v2687_v32 = vadd.f32 %v2686_v28, %v1222_v29  ;;  %v2821_v34 = vmul.f32 %v1222_v29, %v1222_v29  ;;  %v2947_v35 = vadd.f32 %v2946_v26, %v2820_v24  ;;  %v4083_v37 = vpop.f32.mrb[26].mxu0  ;;  %v4904_v13 = vpop.f32.mrb[26].mxu1 }
 0x186   : > { %v3653_v40 = vpack.c.bf16 %v4083_v37, %v4082_v27  ;;  %v1225_v41 = vpop.f32.mrb[27].mxu0  ;;  %v2824_v59 = vmul.f32 %v4083_v37, %v4083_v37  ;;  %v4906_v21 = vpop.f32.mrb[27].mxu1  ;;  %v3813_v23 = vpack.c.bf16 %v4904_v13, %v4900_v2 }
 0x187   : > { %v2948_v44 = vadd.f32 %v2947_v35, %v2821_v34  ;;  %v3648_v46 = vpack.c.bf16 %v1225_v41, %v1222_v29  ;;  %v2688_v47 = vadd.f32 %v2687_v32, %v1225_v41  ;;  %v2822_v48 = vmul.f32 %v1225_v41, %v1225_v41 }
 0x188   : > { %3917 = vst [vmem:[%s4800_s20 + $0x68] sm:$0xff] %v3653_v40   ;;  %v3808_v24 = vpack.c.bf16 %v4906_v21, %v4902_v8  ;;  %3949 = vst [vmem:[%s4800_s20 + $0x168] sm:$0xff] %v3813_v23  }
 0x189   : > { %3916 = vst [vmem:[%s4800_s20 + $0x60] sm:$0xff] %v3648_v46   ;;  %v2689_v56 = vadd.f32 %v4082_v27, %v2688_v47  ;;  %v2949_v58 = vadd.f32 %v2948_v44, %v2822_v48 }
 0x18a   : > { %3948 = vst [vmem:[%s4800_s20 + $0x160] sm:$0xff] %v3808_v24  }
 0x18b   : > { %v2950_v60 = vadd.f32 %v2949_v58, %v2823_v55  ;;  %v4086_v61 = vpop.f32.mrb[28].mxu0  ;;  %v2690_v63 = vadd.f32 %v4083_v37, %v2689_v56  ;;  %v4916_v40 = vpop.f32.mrb[28].mxu1 }
 0x18c   : > { %v1238_v0 = vpop.f32.mrb[29].mxu0  ;;  %v2827_v26 = vmul.f32 %v4086_v61, %v4086_v61  ;;  %v4918_v48 = vpop.f32.mrb[29].mxu1 }
 0x18d   : > { %v2691_v3 = vadd.f32 %v2690_v63, %v1238_v0  ;;  %v2825_v4 = vmul.f32 %v1238_v0, %v1238_v0  ;;  %v2951_v5 = vadd.f32 %v2950_v60, %v2824_v59  ;;  %v4087_v7 = vpop.f32.mrb[30].mxu0  ;;  %v4920_v55 = vpop.f32.mrb[30].mxu1 }
 0x18e   : > { %v3663_v11 = vpack.c.bf16 %v4087_v7, %v4086_v61  ;;  %v1241_v12 = vpop.f32.mrb[31].mxu0  ;;  %v2828_v29 = vmul.f32 %v4087_v7, %v4087_v7  ;;  %v3823_v63 = vpack.c.bf16 %v4920_v55, %v4916_v40 }
 0x18f   : > { %v2952_v15 = vadd.f32 %v2951_v5, %v2825_v4  ;;  %v3658_v18 = vpack.c.bf16 %v1241_v12, %v1238_v0  ;;  %v2692_v19 = vadd.f32 %v2691_v3, %v1241_v12  ;;  %v2826_v20 = vmul.f32 %v1241_v12, %v1241_v12 }
 0x190   : > { %3919 = vst [vmem:[%s4800_s20 + $0x78] sm:$0xff] %v3663_v11   ;;  %3951 = vst [vmem:[%s4800_s20 + $0x178] sm:$0xff] %v3823_v63  }
 0x191   : > { %3918 = vst [vmem:[%s4800_s20 + $0x70] sm:$0xff] %v3658_v18   ;;  %v2693_v27 = vadd.f32 %v4086_v61, %v2692_v19  ;;  %v2953_v28 = vadd.f32 %v2952_v15, %v2826_v20  ;;  %v4922_v61 = vpop.f32.mrb[31].mxu1 }
 0x192   : > { %v3818_v0 = vpack.c.bf16 %v4922_v61, %v4918_v48 }
 0x193   : > { %v2954_v32 = vadd.f32 %v2953_v28, %v2827_v26  ;;  %v4090_v34 = vpop.f32.mrb[32].mxu0  ;;  %v2694_v35 = vadd.f32 %v4087_v7, %v2693_v27  ;;  %v4932_v19 = vpop.f32.mrb[32].mxu1 }
 0x194   : > { %v1254_v37 = vpop.f32.mrb[33].mxu0  ;;  %v2831_v3 = vmul.f32 %v4090_v34, %v4090_v34  ;;  %3950 = vst [vmem:[%s4800_s20 + $0x170] sm:$0xff] %v3818_v0   ;;  %v4934_v27 = vpop.f32.mrb[33].mxu1 }
 0x195   : > { %v2695_v41 = vadd.f32 %v2694_v35, %v1254_v37  ;;  %v2829_v44 = vmul.f32 %v1254_v37, %v1254_v37  ;;  %v2955_v46 = vadd.f32 %v2954_v32, %v2828_v29  ;;  %v4091_v47 = vpop.f32.mrb[34].mxu0  ;;  %v4936_v32 = vpop.f32.mrb[34].mxu1 }
 0x196   : > { %v3673_v52 = vpack.c.bf16 %v4091_v47, %v4090_v34  ;;  %v1257_v53 = vpop.f32.mrb[35].mxu0  ;;  %v2832_v7 = vmul.f32 %v4091_v47, %v4091_v47 }
 0x197   : > { %v2956_v56 = vadd.f32 %v2955_v46, %v2829_v44  ;;  %v3668_v58 = vpack.c.bf16 %v1257_v53, %v1254_v37  ;;  %v2696_v59 = vadd.f32 %v2695_v41, %v1257_v53  ;;  %v2830_v60 = vmul.f32 %v1257_v53, %v1257_v53  ;;  %v4938_v44 = vpop.f32.mrb[35].mxu1 }
 0x198   : > { %3921 = vst [vmem:[%s4800_s20 + $0x88] sm:$0xff] %v3673_v52   ;;  %v3833_v46 = vpack.c.bf16 %v4936_v32, %v4932_v19 }
 0x199   : > { %3920 = vst [vmem:[%s4800_s20 + $0x80] sm:$0xff] %v3668_v58   ;;  %v2697_v4 = vadd.f32 %v4090_v34, %v2696_v59  ;;  %v2957_v5 = vadd.f32 %v2956_v56, %v2830_v60 }
 0x19a   : > { %3953 = vst [vmem:[%s4800_s20 + $0x188] sm:$0xff] %v3833_v46  }
 0x19b   : > { %v2958_v11 = vadd.f32 %v2957_v5, %v2831_v3  ;;  %v4094_v12 = vpop.f32.mrb[36].mxu0  ;;  %v2698_v15 = vadd.f32 %v4091_v47, %v2697_v4  ;;  %v3828_v47 = vpack.c.bf16 %v4938_v44, %v4934_v27  ;;  %v4948_v3 = vpop.f32.mrb[36].mxu1 }
 0x19c   : > { %v1270_v18 = vpop.f32.mrb[37].mxu0  ;;  %v2835_v52 = vmul.f32 %v4094_v12, %v4094_v12 }
 0x19d   : > { %v2699_v20 = vadd.f32 %v2698_v15, %v1270_v18  ;;  %v2833_v23 = vmul.f32 %v1270_v18, %v1270_v18  ;;  %v2959_v24 = vadd.f32 %v2958_v11, %v2832_v7  ;;  %v4095_v26 = vpop.f32.mrb[38].mxu0  ;;  %3952 = vst [vmem:[%s4800_s20 + $0x180] sm:$0xff] %v3828_v47   ;;  %v4950_v15 = vpop.f32.mrb[37].mxu1 }
 0x19e   : > { %v3683_v28 = vpack.c.bf16 %v4095_v26, %v4094_v12  ;;  %v1273_v29 = vpop.f32.mrb[39].mxu0  ;;  %v2836_v58 = vmul.f32 %v4095_v26, %v4095_v26 }
 0x19f   : > { %v2960_v34 = vadd.f32 %v2959_v24, %v2833_v23  ;;  %v3678_v35 = vpack.c.bf16 %v1273_v29, %v1270_v18  ;;  %v2700_v37 = vadd.f32 %v2699_v20, %v1273_v29  ;;  %v2834_v41 = vmul.f32 %v1273_v29, %v1273_v29  ;;  %v4952_v20 = vpop.f32.mrb[38].mxu1 }
 0x1a0   : > { %3923 = vst [vmem:[%s4800_s20 + $0x98] sm:$0xff] %v3683_v28   ;;  %v4954_v29 = vpop.f32.mrb[39].mxu1 }
 0x1a1   : > { %3922 = vst [vmem:[%s4800_s20 + $0x90] sm:$0xff] %v3678_v35   ;;  %v2701_v53 = vadd.f32 %v4094_v12, %v2700_v37  ;;  %v2961_v56 = vadd.f32 %v2960_v34, %v2834_v41  ;;  %v3843_v34 = vpack.c.bf16 %v4952_v20, %v4948_v3  ;;  %v3838_v35 = vpack.c.bf16 %v4954_v29, %v4950_v15 }
 0x1a3   : > { %v2962_v59 = vadd.f32 %v2961_v56, %v2835_v52  ;;  %v4098_v60 = vpop.f32.mrb[40].mxu0  ;;  %v2702_v63 = vadd.f32 %v4095_v26, %v2701_v53  ;;  %3955 = vst [vmem:[%s4800_s20 + $0x198] sm:$0xff] %v3843_v34   ;;  %3954 = vst [vmem:[%s4800_s20 + $0x190] sm:$0xff] %v3838_v35  }
 0x1a4   : > { %v1286_v0 = vpop.f32.mrb[41].mxu0  ;;  %v2839_v37 = vmul.f32 %v4098_v60, %v4098_v60 }
 0x1a5   : > { %v2703_v4 = vadd.f32 %v2702_v63, %v1286_v0  ;;  %v2837_v5 = vmul.f32 %v1286_v0, %v1286_v0  ;;  %v2963_v7 = vadd.f32 %v2962_v59, %v2836_v58  ;;  %v4099_v11 = vpop.f32.mrb[42].mxu0  ;;  %v4964_v59 = vpop.f32.mrb[40].mxu1 }
 0x1a6   : > { %v3693_v12 = vpack.c.bf16 %v4099_v11, %v4098_v60  ;;  %v1289_v18 = vpop.f32.mrb[43].mxu0  ;;  %v2840_v47 = vmul.f32 %v4099_v11, %v4099_v11  ;;  %5388 = vst [vmem:[#allocation15_spill] sm:$0xff] %v4964_v59 }
 0x1a7   : > { %v2964_v23 = vadd.f32 %v2963_v7, %v2837_v5  ;;  %v3688_v24 = vpack.c.bf16 %v1289_v18, %v1286_v0  ;;  %v2704_v26 = vadd.f32 %v2703_v4, %v1289_v18  ;;  %v2838_v28 = vmul.f32 %v1289_v18, %v1289_v18  ;;  %v4966_v7 = vpop.f32.mrb[41].mxu1 }
 0x1a8   : > { %3925 = vst [vmem:[%s4800_s20 + $0xa8] sm:$0xff] %v3693_v12   ;;  %v4968_v18 = vpop.f32.mrb[42].mxu1 }
 0x1a9   : > { %3924 = vst [vmem:[%s4800_s20 + $0xa0] sm:$0xff] %v3688_v24   ;;  %v2705_v41 = vadd.f32 %v4098_v60, %v2704_v26  ;;  %v2965_v46 = vadd.f32 %v2964_v23, %v2838_v28  ;;  %5389 = vst [vmem:[#allocation16_spill] sm:$0xff] %v4968_v18  ;;  %v4970_v28 = vpop.f32.mrb[43].mxu1  ;;  %v3853_v34 = vpack.c.bf16 %v4968_v18, %v4964_v59 }
 0x1aa   : > { %5390 = vst [vmem:[#allocation17_spill] sm:$0xff] %v4970_v28  ;;  %v3848_v35 = vpack.c.bf16 %v4970_v28, %v4966_v7 }
 0x1ab   : > { %v2966_v52 = vadd.f32 %v2965_v46, %v2839_v37  ;;  %v4102_v53 = vpop.f32.mrb[44].mxu0  ;;  %v2706_v56 = vadd.f32 %v4099_v11, %v2705_v41  ;;  %3957 = vst [vmem:[%s4800_s20 + $0x1a8] sm:$0xff] %v3853_v34  }
 0x1ac   : > { %v1302_v58 = vpop.f32.mrb[45].mxu0  ;;  %v2843_v37 = vmul.f32 %v4102_v53, %v4102_v53  ;;  %3956 = vst [vmem:[%s4800_s20 + $0x1a0] sm:$0xff] %v3848_v35  }
 0x1ad   : > { %v2707_v63 = vadd.f32 %v2706_v56, %v1302_v58  ;;  %v2841_v0 = vmul.f32 %v1302_v58, %v1302_v58  ;;  %v2967_v4 = vadd.f32 %v2966_v52, %v2840_v47  ;;  %v4103_v5 = vpop.f32.mrb[46].mxu0 }
 0x1ae   : > { %v3703_v60 = vpack.c.bf16 %v4103_v5, %v4102_v53  ;;  %v1305_v12 = vpop.f32.mrb[47].mxu0  ;;  %v2844_v47 = vmul.f32 %v4103_v5, %v4103_v5 }
 0x1af   : > { %v2968_v23 = vadd.f32 %v2967_v4, %v2841_v0  ;;  %v3698_v24 = vpack.c.bf16 %v1305_v12, %v1302_v58  ;;  %v2708_v11 = vadd.f32 %v2707_v63, %v1305_v12  ;;  %v2842_v26 = vmul.f32 %v1305_v12, %v1305_v12  ;;  %v4980_v0 = vpop.f32.mrb[44].mxu1 }
 0x1b0   : > { %3927 = vst [vmem:[%s4800_s20 + $0xb8] sm:$0xff] %v3703_v60   ;;  %5391 = vst [vmem:[#allocation18_spill] sm:$0xff] %v4980_v0  ;;  %v4982_v59 = vpop.f32.mrb[45].mxu1 }
 0x1b1   : > { %3926 = vst [vmem:[%s4800_s20 + $0xb0] sm:$0xff] %v3698_v24   ;;  %v2709_v41 = vadd.f32 %v4102_v53, %v2708_v11  ;;  %v2969_v46 = vadd.f32 %v2968_v23, %v2842_v26  ;;  %5392 = vst [vmem:[#allocation19_spill] sm:$0xff] %v4982_v59  ;;  %v4984_v24 = vpop.f32.mrb[46].mxu1 }
 0x1b2   : > { %5393 = vst [vmem:[#allocation20_spill] sm:$0xff] %v4984_v24  ;;  %v4986_v35 = vpop.f32.mrb[47].mxu1 }
 0x1b3   : > { %v2970_v52 = vadd.f32 %v2969_v46, %v2843_v37  ;;  %v4106_v56 = vpop.f32.mrb[48].mxu0  ;;  %v2710_v58 = vadd.f32 %v4103_v5, %v2709_v41  ;;  %5394 = vst [vmem:[#allocation21_spill] sm:$0xff] %v4986_v35  ;;  %v3863_v37 = vpack.c.bf16 %v4984_v24, %v4980_v0  ;;  %v3858_v41 = vpack.c.bf16 %v4986_v35, %v4982_v59 }
 0x1b4   : > { %v1318_v63 = vpop.f32.mrb[49].mxu0  ;;  %v2847_v46 = vmul.f32 %v4106_v56, %v4106_v56 }
 0x1b5   : > { %v2711_v4 = vadd.f32 %v2710_v58, %v1318_v63  ;;  %v2845_v60 = vmul.f32 %v1318_v63, %v1318_v63  ;;  %v2971_v12 = vadd.f32 %v2970_v52, %v2844_v47  ;;  %v4107_v18 = vpop.f32.mrb[50].mxu0  ;;  %3959 = vst [vmem:[%s4800_s20 + $0x1b8] sm:$0xff] %v3863_v37   ;;  %3958 = vst [vmem:[%s4800_s20 + $0x1b0] sm:$0xff] %v3858_v41  }
 0x1b6   : > { %v3713_v53 = vpack.c.bf16 %v4107_v18, %v4106_v56  ;;  %v1321_v23 = vpop.f32.mrb[51].mxu0  ;;  %v2848_v58 = vmul.f32 %v4107_v18, %v4107_v18 }
 0x1b7   : > { %v2972_v11 = vadd.f32 %v2971_v12, %v2845_v60  ;;  %v3708_v26 = vpack.c.bf16 %v1321_v23, %v1318_v63  ;;  %v2712_v5 = vadd.f32 %v2711_v4, %v1321_v23  ;;  %v2846_v34 = vmul.f32 %v1321_v23, %v1321_v23  ;;  %v4996_v23 = vpop.f32.mrb[48].mxu1 }
 0x1b8   : > { %3929 = vst [vmem:[%s4800_s20 + $0xc8] sm:$0xff] %v3713_v53   ;;  %5395 = vst [vmem:[#allocation22_spill] sm:$0xff] %v4996_v23  ;;  %v4998_v35 = vpop.f32.mrb[49].mxu1 }
 0x1b9   : > { %3928 = vst [vmem:[%s4800_s20 + $0xc0] sm:$0xff] %v3708_v26   ;;  %v2713_v47 = vadd.f32 %v4106_v56, %v2712_v5  ;;  %v2973_v52 = vadd.f32 %v2972_v11, %v2846_v34  ;;  %5396 = vst [vmem:[#allocation23_spill] sm:$0xff] %v4998_v35  ;;  %v5000_v26 = vpop.f32.mrb[50].mxu1 }
 0x1ba   : > { %5397 = vst [vmem:[#allocation24_spill] sm:$0xff] %v5000_v26  ;;  %v5002_v41 = vpop.f32.mrb[51].mxu1 }
 0x1bb   : > { %v2974_v60 = vadd.f32 %v2973_v52, %v2847_v46  ;;  %v4110_v63 = vpop.f32.mrb[52].mxu0  ;;  %v2714_v4 = vadd.f32 %v4107_v18, %v2713_v47  ;;  %5398 = vst [vmem:[#allocation25_spill] sm:$0xff] %v5002_v41  ;;  %v3873_v46 = vpack.c.bf16 %v5000_v26, %v4996_v23  ;;  %v3868_v47 = vpack.c.bf16 %v5002_v41, %v4998_v35 }
 0x1bc   : > { %v1334_v12 = vpop.f32.mrb[53].mxu0  ;;  %v2851_v52 = vmul.f32 %v4110_v63, %v4110_v63 }
 0x1bd   : > { %v2715_v53 = vadd.f32 %v2714_v4, %v1334_v12  ;;  %v2849_v28 = vmul.f32 %v1334_v12, %v1334_v12  ;;  %v2975_v24 = vadd.f32 %v2974_v60, %v2848_v58  ;;  %v4111_v0 = vpop.f32.mrb[54].mxu0  ;;  %3961 = vst [vmem:[%s4800_s20 + $0x1c8] sm:$0xff] %v3873_v46   ;;  %3960 = vst [vmem:[%s4800_s20 + $0x1c0] sm:$0xff] %v3868_v47  }
 0x1be   : > { %v3723_v56 = vpack.c.bf16 %v4111_v0, %v4110_v63  ;;  %v1337_v11 = vpop.f32.mrb[55].mxu0  ;;  %v2852_v4 = vmul.f32 %v4111_v0, %v4111_v0 }
 0x1bf   : > { %v2976_v5 = vadd.f32 %v2975_v24, %v2849_v28  ;;  %v3718_v34 = vpack.c.bf16 %v1337_v11, %v1334_v12  ;;  %v2716_v18 = vadd.f32 %v2715_v53, %v1337_v11  ;;  %v2850_v37 = vmul.f32 %v1337_v11, %v1337_v11  ;;  %v5012_v11 = vpop.f32.mrb[52].mxu1 }
 0x1c0   : > { %3931 = vst [vmem:[%s4800_s20 + $0xd8] sm:$0xff] %v3723_v56   ;;  %5399 = vst [vmem:[#allocation26_spill] sm:$0xff] %v5012_v11  ;;  %v5014_v41 = vpop.f32.mrb[53].mxu1 }
 0x1c1   : > { %3930 = vst [vmem:[%s4800_s20 + $0xd0] sm:$0xff] %v3718_v34   ;;  %v2717_v58 = vadd.f32 %v4110_v63, %v2716_v18  ;;  %v2977_v60 = vadd.f32 %v2976_v5, %v2850_v37  ;;  %v5016_v34 = vpop.f32.mrb[54].mxu1 }
 0x1c2   : > { %5400 = vst [vmem:[#allocation27_spill] sm:$0xff] %v5016_v34  ;;  %v5018_v47 = vpop.f32.mrb[55].mxu1 }
 0x1c3   : > { %v2978_v28 = vadd.f32 %v2977_v60, %v2851_v52  ;;  %v4114_v24 = vpop.f32.mrb[56].mxu0  ;;  %v2718_v12 = vadd.f32 %v4111_v0, %v2717_v58  ;;  %5401 = vst [vmem:[#allocation28_spill] sm:$0xff] %v5018_v47  ;;  %v3883_v52 = vpack.c.bf16 %v5016_v34, %v5012_v11  ;;  %v3878_v58 = vpack.c.bf16 %v5018_v47, %v5014_v41 }
 0x1c4   : > { %v1350_v53 = vpop.f32.mrb[57].mxu0  ;;  %v2855_v60 = vmul.f32 %v4114_v24, %v4114_v24 }
 0x1c5   : > { %v2719_v56 = vadd.f32 %v2718_v12, %v1350_v53  ;;  %v2853_v59 = vmul.f32 %v1350_v53, %v1350_v53  ;;  %v2979_v26 = vadd.f32 %v2978_v28, %v2852_v4  ;;  %v4115_v23 = vpop.f32.mrb[58].mxu0  ;;  %3963 = vst [vmem:[%s4800_s20 + $0x1d8] sm:$0xff] %v3883_v52   ;;  %3962 = vst [vmem:[%s4800_s20 + $0x1d0] sm:$0xff] %v3878_v58  }
 0x1c6   : > { %v3733_v63 = vpack.c.bf16 %v4115_v23, %v4114_v24  ;;  %v1353_v5 = vpop.f32.mrb[59].mxu0  ;;  %v2856_v12 = vmul.f32 %v4115_v23, %v4115_v23 }
 0x1c7   : > { %v2980_v18 = vadd.f32 %v2979_v26, %v2853_v59  ;;  %v3728_v37 = vpack.c.bf16 %v1353_v5, %v1350_v53  ;;  %v2720_v0 = vadd.f32 %v2719_v56, %v1353_v5  ;;  %v2854_v46 = vmul.f32 %v1353_v5, %v1353_v5  ;;  %v5028_v5 = vpop.f32.mrb[56].mxu1 }
 0x1c8   : > { %3933 = vst [vmem:[%s4800_s20 + $0xe8] sm:$0xff] %v3733_v63   ;;  %v5030_v47 = vpop.f32.mrb[57].mxu1 }
 0x1c9   : > { %3932 = vst [vmem:[%s4800_s20 + $0xe0] sm:$0xff] %v3728_v37   ;;  %v2721_v4 = vadd.f32 %v4114_v24, %v2720_v0  ;;  %v2981_v28 = vadd.f32 %v2980_v18, %v2854_v46  ;;  %v5032_v37 = vpop.f32.mrb[58].mxu1 }
 0x1ca   : > { %5402 = vst [vmem:[#allocation29_spill] sm:$0xff] %v5032_v37  ;;  %v5034_v58 = vpop.f32.mrb[59].mxu1 }
 0x1cb   : > { %v2982_v59 = vadd.f32 %v2981_v28, %v2855_v60  ;;  %v4118_v26 = vpop.f32.mrb[60].mxu0  ;;  %v2722_v53 = vadd.f32 %v4115_v23, %v2721_v4  ;;  %v3893_v60 = vpack.c.bf16 %v5032_v37, %v5028_v5  ;;  %v3888_v4 = vpack.c.bf16 %v5034_v58, %v5030_v47 }
 0x1cc   : > { %v1366_v56 = vpop.f32.mrb[61].mxu0  ;;  %v2859_v28 = vmul.f32 %v4118_v26, %v4118_v26 }
 0x1cd   : > { %v2723_v63 = vadd.f32 %v2722_v53, %v1366_v56  ;;  %v2857_v35 = vmul.f32 %v1366_v56, %v1366_v56  ;;  %v2983_v34 = vadd.f32 %v2982_v59, %v2856_v12  ;;  %v4119_v11 = vpop.f32.mrb[62].mxu0  ;;  %3965 = vst [vmem:[%s4800_s20 + $0x1e8] sm:$0xff] %v3893_v60   ;;  %3964 = vst [vmem:[%s4800_s20 + $0x1e0] sm:$0xff] %v3888_v4  }
 0x1ce   : > { %v3743_v24 = vpack.c.bf16 %v4119_v11, %v4118_v26  ;;  %v1369_v18 = vpop.f32.mrb[63].mxu0  ;;  %v2860_v53 = vmul.f32 %v4119_v11, %v4119_v11 }
 0x1cf   : > { %v2984_v0 = vadd.f32 %v2983_v34, %v2857_v35  ;;  %v3738_v46 = vpack.c.bf16 %v1369_v18, %v1366_v56  ;;  %v2724_v23 = vadd.f32 %v2723_v63, %v1369_v18  ;;  %v2858_v52 = vmul.f32 %v1369_v18, %v1369_v18  ;;  %v5046_v63 = vpop.f32.mrb[60].mxu1 }
 0x1d0   : > { %3935 = vst [vmem:[%s4800_s20 + $0xf8] sm:$0xff] %v3743_v24   ;;  %v2861_v56 = vmul.f32 %v4806_v30, %v4806_v30  ;;  %v5049_v37 = vpop.f32.mrb[61].mxu1 }
 0x1d1   : > { %3934 = vst [vmem:[%s4800_s20 + $0xf0] sm:$0xff] %v3738_v46   ;;  %v2725_v12 = vadd.f32 %v4118_v26, %v2724_v23  ;;  %v2985_v59 = vadd.f32 %v2984_v0, %v2858_v52  ;;  %v5051_v46 = vpop.f32.mrb[62].mxu1 }
 0x1d2   : > { %v3903_v23 = vpack.c.bf16 %v5051_v46, %v5046_v63  ;;  %v5058_v52 = vpop.f32.mrb[63].mxu1 }
 0x1d3   : > { %v2726_v35 = vadd.f32 %v4119_v11, %v2725_v12  ;;  %v2986_v34 = vadd.f32 %v2985_v59, %v2859_v28  ;;  %v2862_v11 = vmul.f32 %v4810_v38, %v4810_v38  ;;  %v3898_v60 = vpack.c.bf16 %v5058_v52, %v5049_v37 }
 0x1d4   : > { %3967 = vst [vmem:[%s4800_s20 + $0x1f8] sm:$0xff] %v3903_v23  }
 0x1d5   : > { %v2987_v24 = vadd.f32 %v2986_v34, %v2860_v53  ;;  %v2727_v18 = vadd.f32 %v2726_v35, %v4806_v30  ;;  %v2863_v30 = vmul.f32 %v4804_v25, %v4804_v25  ;;  %3966 = vst [vmem:[%s4800_s20 + $0x1f0] sm:$0xff] %v3898_v60   ;;  %v2865_v53 = vmul.f32 %v4822_v54, %v4822_v54 }
 0x1d7   : > { %v2988_v26 = vadd.f32 %v2987_v24, %v2861_v56  ;;  %v2728_v0 = vadd.f32 %v2727_v18, %v4810_v38  ;;  %v2864_v38 = vmul.f32 %v4808_v33, %v4808_v33 }
 0x1d9   : > { %v2729_v4 = vadd.f32 %v4804_v25, %v2728_v0  ;;  %v2989_v28 = vadd.f32 %v2988_v26, %v2862_v11  ;;  %v2866_v25 = vmul.f32 %v4826_v62, %v4826_v62  ;;  %v2869_v11 = vmul.f32 %v4838_v14, %v4838_v14 }
 0x1db   : > { %v2990_v12 = vadd.f32 %v2989_v28, %v2863_v30  ;;  %v2730_v59 = vadd.f32 %v4808_v33, %v2729_v4  ;;  %v2867_v33 = vmul.f32 %v4820_v49, %v4820_v49 }
 0x1dd   : > { %v2731_v35 = vadd.f32 %v2730_v59, %v4822_v54  ;;  %v2991_v34 = vadd.f32 %v2990_v12, %v2864_v38 }
 0x1df   : > { %v2992_v56 = vadd.f32 %v2991_v34, %v2865_v53  ;;  %v2732_v24 = vadd.f32 %v2731_v35, %v4826_v62  ;;  %v2868_v62 = vmul.f32 %v4824_v57, %v4824_v57 }
 0x1e1   : > { %v2733_v54 = vadd.f32 %v4820_v49, %v2732_v24  ;;  %v2993_v18 = vadd.f32 %v2992_v56, %v2866_v25 }
 0x1e3   : > { %v2994_v26 = vadd.f32 %v2993_v18, %v2867_v33  ;;  %v2734_v0 = vadd.f32 %v4824_v57, %v2733_v54 }
 0x1e4   : > { %4425 = shalt.err (!%p4422_p5)
}
 0x1e5   : > { %s4426_s4 = scalar_lea.hbm %s5080_s11, 8192  ;;  %s4430_s7 = scalar_lea.hbm %s5339_s2, 16384 }
 0x1e6   : > { %p4427_p9 = scmp.ne.s32.totalorder %s5080_s11, %s4426_s4  ;;  %p4431_p3 = scmp.lt.u32.totalorder %s5080_s11, %s5339_s2 }
 0x1e7   : > { %p4432_p7 = scmp.lt.u32.totalorder %s4430_s7, %s4426_s4  ;;  %p4434_p4 = scmp.lt.u32.totalorder %s4426_s4, %s5080_s11 }
 0x1e8   : > { %p4428_p1 = pnand %p4427_p9, %p4659_p10 }
 0x1e9   : > { %p4433_p13 = por %p4432_p7, %p4431_p3 }
 0x1ea   : > { %p4429_p2 = pneg %p4428_p1 }
 0x1eb   : > { %p4435_p6 = por %p4434_p4, %p4433_p13 }
 0x1ed   : > { %p4436_p8 = pnand %p4435_p6, %p4429_p2 }
 0x1ef   : > { %4439 = shalt.err (!%p4436_p8)
}
 0x1f0   : > { %s4537_s22 = smov 64   ;;  %s4538_s24 = smov 4   ;;  %v2735_v49 = vadd.f32 %v2734_v0, %v4838_v14  ;;  %v2995_v57 = vadd.f32 %v2994_v26, %v2868_v62  ;;  %v2870_v30 = vmul.f32 %v4842_v22, %v4842_v22  ;;  %v2871_v4 = vmul.f32 %v4836_v9, %v4836_v9 }
 0x1f1   : > { %4206 = dma.vmem_to_hbm [thread:$0]  (%p4659_p10), %s5086_s9, 8192, %s5080_s11, %s3067_s18, %s4537_s22, %s4537_s22, %s4538_s24   ;;  %v2872_v12 = vmul.f32 %v4840_v17, %v4840_v17  ;;  %v2873_v14 = vmul.f32 %v4854_v42, %v4854_v42  ;;  %v2874_v24 = vmul.f32 %v4858_v51, %v4858_v51 }
 0x1f2   : > { %v2996_v23 = vadd.f32 %v2995_v57, %v2869_v11  ;;  %v2736_v60 = vadd.f32 %v2735_v49, %v4842_v22  ;;  %v2878_v11 = vmul.f32 %v4874_v16, %v4874_v16  ;;  %s3247_s10 = sshll.u32 %s4718_s30, 3  ;;  %s3452_s11 = sshll.u32 %s4522_s15, 7 }
 0x1f3   : > { %s251_s9 = scalar_lea.vmem [#allocation9], %s3247_s10  ;;  %s5288_s26 = scalar_lea.hbm %s5340_s3, %s3452_s11 }
 0x1f4   : > { %v2737_v28 = vadd.f32 %v4836_v9, %v2736_v60  ;;  %v2997_v38 = vadd.f32 %v2996_v23, %v2870_v30  ;;  %v2875_v9 = vmul.f32 %v4852_v36, %v4852_v36  ;;  %s3103_s18 = sshll.u32 %s251_s9, 4  ;;  %s3072_s21 = scalar_lea.sflag [#allocation10], %s4718_s30  ;;  %s5290_s18 = int_to_ptr.vmem [resolvable:$true] %s3103_s18 }
 0x1f5   : > { %s4440_s4 = scalar_lea.vmem %s5290_s18, 128  ;;  %s4539_s15 = smov [#allocation9]  }
 0x1f6   : > { %v2998_v59 = vadd.f32 %v2997_v38, %v2871_v4  ;;  %v2738_v53 = vadd.f32 %v4840_v17, %v2737_v28  ;;  %v2876_v17 = vmul.f32 %v4856_v45, %v4856_v45  ;;  %v2882_v38 = vmul.f32 %v4890_v50, %v4890_v50  ;;  %p4441_p12 = scmp.ne.s32.totalorder %s5290_s18, %s4440_s4  ;;  %s4444_s6 = sshll.u32 %s4539_s15, 4  ;;  %s4445_s6 = int_to_ptr.vmem [resolvable:$false] %s4444_s6 }
 0x1f7   : > { %s4446_s29 = scalar_lea.vmem %s4445_s6, 256  ;;  %p4447_p5 = scmp.lt.s32.totalorder %s5290_s18, %s4445_s6 }
 0x1f8   : > { %v2739_v35 = vadd.f32 %v2738_v53, %v4854_v42  ;;  %v2999_v34 = vadd.f32 %v2998_v59, %v2872_v12  ;;  %v2877_v42 = vmul.f32 %v4870_v6, %v4870_v6  ;;  %p4442_p11 = pnand %p4441_p12, %p4659_p10  ;;  %p4448_p9 = scmp.lt.s32.totalorder %s4446_s29, %s4440_s4 }
 0x1fa   : > { %v3000_v56 = vadd.f32 %v2999_v34, %v2873_v14  ;;  %v2740_v22 = vadd.f32 %v2739_v35, %v4858_v51  ;;  %p4443_p0 = pneg %p4442_p11  ;;  %p4449_p1 = por %p4448_p9, %p4447_p5 }
 0x1fc   : > { %v2741_v25 = vadd.f32 %v4852_v36, %v2740_v22  ;;  %v3001_v33 = vadd.f32 %v3000_v56, %v2874_v24  ;;  %v2879_v36 = vmul.f32 %v4868_v1, %v4868_v1  ;;  %v2886_v22 = vmul.f32 %v4906_v21, %v4906_v21  ;;  %p4450_p2 = pnand %p4449_p1, %p4443_p0 }
 0x1fe   : > { %v3002_v54 = vadd.f32 %v3001_v33, %v2875_v9  ;;  %v2742_v18 = vadd.f32 %v4856_v45, %v2741_v25  ;;  %v2880_v45 = vmul.f32 %v4872_v10, %v4872_v10 }
 0x200   : > { %v2743_v62 = vadd.f32 %v2742_v18, %v4870_v6  ;;  %v3003_v26 = vadd.f32 %v3002_v54, %v2876_v17  ;;  %v2881_v6 = vmul.f32 %v4886_v39, %v4886_v39 }
 0x202   : > { %v3004_v0 = vadd.f32 %v3003_v26, %v2877_v42  ;;  %v2744_v51 = vadd.f32 %v2743_v62, %v4874_v16  ;;  %v2890_v42 = vmul.f32 %v4922_v61, %v4922_v61 }
 0x204   : > { %v2745_v49 = vadd.f32 %v4868_v1, %v2744_v51  ;;  %v3005_v57 = vadd.f32 %v3004_v0, %v2878_v11  ;;  %v2883_v1 = vmul.f32 %v4884_v31, %v4884_v31 }
 0x206   : > { %v3006_v23 = vadd.f32 %v3005_v57, %v2879_v36  ;;  %v2746_v60 = vadd.f32 %v4872_v10, %v2745_v49  ;;  %v2884_v10 = vmul.f32 %v4888_v43, %v4888_v43  ;;  %v2894_v57 = vmul.f32 %v4938_v44, %v4938_v44 }
 0x208   : > { %v2747_v30 = vadd.f32 %v2746_v60, %v4886_v39  ;;  %v3007_v4 = vadd.f32 %v3006_v23, %v2880_v45  ;;  %v2885_v39 = vmul.f32 %v4902_v8, %v4902_v8 }
 0x20a   : > { %v3008_v28 = vadd.f32 %v3007_v4, %v2881_v6  ;;  %v2748_v16 = vadd.f32 %v2747_v30, %v4890_v50 }
 0x20c   : > { %v2749_v12 = vadd.f32 %v4884_v31, %v2748_v16  ;;  %v3009_v59 = vadd.f32 %v3008_v28, %v2882_v38  ;;  %v2887_v31 = vmul.f32 %v4900_v2, %v4900_v2  ;;  %v2898_v16 = vmul.f32 %v4954_v29, %v4954_v29 }
 0x20e   : > { %v3010_v53 = vadd.f32 %v3009_v59, %v2883_v1  ;;  %v2750_v14 = vadd.f32 %v4888_v43, %v2749_v12  ;;  %v2888_v43 = vmul.f32 %v4904_v13, %v4904_v13 }
 0x210   : > { %v2751_v35 = vadd.f32 %v2750_v14, %v4902_v8  ;;  %v3011_v34 = vadd.f32 %v3010_v53, %v2884_v10  ;;  %v2889_v8 = vmul.f32 %v4918_v48, %v4918_v48 }
 0x212   : > { %v3012_v56 = vadd.f32 %v3011_v34, %v2885_v39  ;;  %v2752_v50 = vadd.f32 %v2751_v35, %v4906_v21 }
 0x214   : > { %v2753_v24 = vadd.f32 %v4900_v2, %v2752_v50  ;;  %v3013_v9 = vadd.f32 %v3012_v56, %v2886_v22  ;;  %v2891_v2 = vmul.f32 %v4916_v40, %v4916_v40  ;;  %v5405_v22 = vld [vmem:[#allocation16_spill] sm:$0xff] }
 0x216   : > { %v3014_v25 = vadd.f32 %v3013_v9, %v2887_v31  ;;  %v2754_v33 = vadd.f32 %v4904_v13, %v2753_v24  ;;  %v2892_v13 = vmul.f32 %v4920_v55, %v4920_v55 }
 0x218   : > { %v2755_v17 = vadd.f32 %v2754_v33, %v4918_v48  ;;  %v3015_v54 = vadd.f32 %v3014_v25, %v2888_v43  ;;  %v2893_v48 = vmul.f32 %v4934_v27, %v4934_v27 }
 0x21a   : > { %v3016_v18 = vadd.f32 %v3015_v54, %v2889_v8  ;;  %v2756_v21 = vadd.f32 %v2755_v17, %v4922_v61  ;;  %v5407_v8 = vld [vmem:[#allocation21_spill] sm:$0xff] }
 0x21b   : > { %v2906_v54 = vmul.f32 %v5407_v8, %v5407_v8 }
 0x21c   : > { %v2757_v62 = vadd.f32 %v4916_v40, %v2756_v21  ;;  %v3017_v26 = vadd.f32 %v3016_v18, %v2890_v42  ;;  %v2895_v40 = vmul.f32 %v4932_v19, %v4932_v19  ;;  %v5408_v18 = vld [vmem:[#allocation18_spill] sm:$0xff] }
 0x21d   : > { %v2907_v21 = vmul.f32 %v5408_v18, %v5408_v18 }
 0x21e   : > { %v3018_v0 = vadd.f32 %v3017_v26, %v2891_v2  ;;  %v2758_v51 = vadd.f32 %v4920_v55, %v2757_v62  ;;  %v2896_v55 = vmul.f32 %v4936_v32, %v4936_v32  ;;  %v5409_v62 = vld [vmem:[#allocation20_spill] sm:$0xff] }
 0x21f   : > { %v2908_v26 = vmul.f32 %v5409_v62, %v5409_v62 }
 0x220   : > { %v2759_v11 = vadd.f32 %v2758_v51, %v4934_v27  ;;  %v3019_v36 = vadd.f32 %v3018_v0, %v2892_v13  ;;  %v2897_v27 = vmul.f32 %v4950_v15, %v4950_v15  ;;  %v5410_v51 = vld [vmem:[#allocation23_spill] sm:$0xff] }
 0x222   : > { %v3020_v49 = vadd.f32 %v3019_v36, %v2893_v48  ;;  %v2760_v61 = vadd.f32 %v2759_v11, %v4938_v44  ;;  %v2909_v48 = vmul.f32 %v5410_v51, %v5410_v51 }
 0x224   : > { %v2761_v45 = vadd.f32 %v4932_v19, %v2760_v61  ;;  %v3021_v23 = vadd.f32 %v3020_v49, %v2894_v57  ;;  %v2899_v19 = vmul.f32 %v4948_v3, %v4948_v3  ;;  %v5411_v61 = vld [vmem:[#allocation25_spill] sm:$0xff] }
 0x226   : > { %v3022_v60 = vadd.f32 %v3021_v23, %v2895_v40  ;;  %v2762_v6 = vadd.f32 %v4936_v32, %v2761_v45  ;;  %v2900_v32 = vmul.f32 %v4952_v20, %v4952_v20  ;;  %v2910_v40 = vmul.f32 %v5411_v61, %v5411_v61  ;;  %v5412_v45 = vld [vmem:[#allocation22_spill] sm:$0xff] }
 0x227   : > { %v2911_v23 = vmul.f32 %v5412_v45, %v5412_v45 }
 0x228   : > { %v2763_v30 = vadd.f32 %v2762_v6, %v4950_v15  ;;  %v3023_v4 = vadd.f32 %v3022_v60, %v2896_v55  ;;  %v2901_v15 = vmul.f32 %v4966_v7, %v4966_v7  ;;  %v5413_v6 = vld [vmem:[#allocation24_spill] sm:$0xff] }
 0x22a   : > { %v3024_v28 = vadd.f32 %v3023_v4, %v2897_v27  ;;  %v2764_v44 = vadd.f32 %v2763_v30, %v4954_v29  ;;  %v5403_v29 = vld [vmem:[#allocation17_spill] sm:$0xff]  ;;  %v2912_v27 = vmul.f32 %v5413_v6, %v5413_v6 }
 0x22b   : > { %v2902_v35 = vmul.f32 %v5403_v29, %v5403_v29 }
 0x22c   : > { %v2765_v38 = vadd.f32 %v4948_v3, %v2764_v44  ;;  %v3025_v1 = vadd.f32 %v3024_v28, %v2898_v16  ;;  %v5404_v3 = vld [vmem:[#allocation15_spill] sm:$0xff]  ;;  %v2913_v28 = vmul.f32 %v5014_v41, %v5014_v41 }
 0x22d   : > { %v2903_v34 = vmul.f32 %v5404_v3, %v5404_v3 }
 0x22e   : > { %v3026_v12 = vadd.f32 %v3025_v1, %v2899_v19  ;;  %v2766_v59 = vadd.f32 %v4952_v20, %v2765_v38  ;;  %v2904_v20 = vmul.f32 %v5405_v22, %v5405_v22  ;;  %v5414_v38 = vld [vmem:[#allocation28_spill] sm:$0xff] }
 0x230   : > { %v2767_v10 = vadd.f32 %v2766_v59, %v4966_v7  ;;  %v3027_v53 = vadd.f32 %v3026_v12, %v2900_v32  ;;  %v5406_v7 = vld [vmem:[#allocation19_spill] sm:$0xff]  ;;  %v2914_v32 = vmul.f32 %v5414_v38, %v5414_v38  ;;  %v5415_v12 = vld [vmem:[#allocation26_spill] sm:$0xff] }
 0x231   : > { %v2905_v9 = vmul.f32 %v5406_v7, %v5406_v7  ;;  %v2915_v59 = vmul.f32 %v5415_v12, %v5415_v12 }
 0x232   : > { %v3028_v14 = vadd.f32 %v3027_v53, %v2901_v15  ;;  %v2768_v39 = vadd.f32 %v2767_v10, %v5403_v29  ;;  %v5416_v53 = vld [vmem:[#allocation27_spill] sm:$0xff] }
 0x234   : > { %v2769_v56 = vadd.f32 %v5404_v3, %v2768_v39  ;;  %v3029_v50 = vadd.f32 %v3028_v14, %v2902_v35  ;;  %v2916_v14 = vmul.f32 %v5416_v53, %v5416_v53 }
 0x236   : > { %v3030_v31 = vadd.f32 %v3029_v50, %v2903_v34  ;;  %v2770_v24 = vadd.f32 %v5405_v22, %v2769_v56  ;;  %v2918_v50 = vmul.f32 %v5034_v58, %v5034_v58  ;;  %v2919_v22 = vmul.f32 %v5028_v5, %v5028_v5 }
 0x238   : > { %v2771_v43 = vadd.f32 %v2770_v24, %v5406_v7  ;;  %v3031_v25 = vadd.f32 %v3030_v31, %v2904_v20  ;;  %v5417_v24 = vld [vmem:[#allocation29_spill] sm:$0xff] }
 0x239   : > { %v2920_v7 = vmul.f32 %v5417_v24, %v5417_v24 }
 0x23a   : > { %v3032_v33 = vadd.f32 %v3031_v25, %v2905_v9  ;;  %v2772_v17 = vadd.f32 %v2771_v43, %v5407_v8 }
 0x23c   : > { %v2773_v42 = vadd.f32 %v5408_v18, %v2772_v17  ;;  %v3033_v2 = vadd.f32 %v3032_v33, %v2906_v54  ;;  %v2922_v17 = vmul.f32 %v5058_v52, %v5058_v52 }
 0x23e   : > { %v3034_v13 = vadd.f32 %v3033_v2, %v2907_v21  ;;  %v2774_v0 = vadd.f32 %v5409_v62, %v2773_v42  ;;  %v2924_v21 = vmul.f32 %v5051_v46, %v5051_v46 }
 0x240   : > { %v2775_v11 = vadd.f32 %v2774_v0, %v5410_v51  ;;  %v3035_v36 = vadd.f32 %v3034_v13, %v2908_v26  ;;  %v3058_v0 = vlaneseq }
 0x242   : > { %v3036_v49 = vadd.f32 %v3035_v36, %v2909_v48  ;;  %v2776_v57 = vadd.f32 %v2775_v11, %v5411_v61  ;;  %v3059_v36 = vshrl.u32 %v3058_v0, 7 }
 0x244   : > { %v2777_v55 = vadd.f32 %v5412_v45, %v2776_v57  ;;  %v3037_v60 = vadd.f32 %v3036_v49, %v2910_v40  ;;  %vm3060_vm0 = vcmp.eq.s32.totalorder %v3059_v36, 0  ;;  %vm3062_vm1 = vcmp.eq.s32.totalorder %v3059_v36, 1 }
 0x246   : > { %v3038_v30 = vadd.f32 %v3037_v60, %v2911_v23  ;;  %v2778_v4 = vadd.f32 %v5413_v6, %v2777_v55 }
 0x248   : > { %v2779_v44 = vadd.f32 %v2778_v4, %v5014_v41  ;;  %v3039_v16 = vadd.f32 %v3038_v30, %v2912_v27  ;;  %v2917_v41 = vmul.f32 %v5030_v47, %v5030_v47 }
 0x24a   : > { %v3040_v19 = vadd.f32 %v3039_v16, %v2913_v28  ;;  %v2780_v1 = vadd.f32 %v2779_v44, %v5414_v38 }
 0x24c   : > { %v2781_v15 = vadd.f32 %v5415_v12, %v2780_v1  ;;  %v3041_v10 = vadd.f32 %v3040_v19, %v2914_v32 }
 0x24e   : > { %v3042_v29 = vadd.f32 %v3041_v10, %v2915_v59  ;;  %v2782_v39 = vadd.f32 %v5416_v53, %v2781_v15 }
 0x250   : > { %v2783_v35 = vadd.f32 %v2782_v39, %v5030_v47  ;;  %v3043_v3 = vadd.f32 %v3042_v29, %v2916_v14  ;;  %v2921_v47 = vmul.f32 %v5049_v37, %v5049_v37 }
 0x252   : > { %v3044_v34 = vadd.f32 %v3043_v3, %v2917_v41  ;;  %v2784_v56 = vadd.f32 %v2783_v35, %v5034_v58 }
 0x254   : > { %v2785_v20 = vadd.f32 %v5028_v5, %v2784_v56  ;;  %v3045_v31 = vadd.f32 %v3044_v34, %v2918_v50  ;;  %v2923_v5 = vmul.f32 %v5046_v63, %v5046_v63 }
 0x256   : > { %v3046_v9 = vadd.f32 %v3045_v31, %v2919_v22  ;;  %v2786_v43 = vadd.f32 %v5417_v24, %v2785_v20 }
 0x258   : > { %v2787_v25 = vadd.f32 %v2786_v43, %v5049_v37  ;;  %v3047_v33 = vadd.f32 %v3046_v9, %v2920_v7 }
 0x25a   : > { %v3048_v8 = vadd.f32 %v3047_v33, %v2921_v47  ;;  %v2788_v58 = vadd.f32 %v2787_v25, %v5058_v52 }
 0x25c   : > { %v2789_v54 = vadd.f32 %v5046_v63, %v2788_v58  ;;  %v3049_v18 = vadd.f32 %v3048_v8, %v2922_v17 }
 0x25e   : > { %v2790_v42 = vadd.f32 %v5051_v46, %v2789_v54  ;;  %v3050_v37 = vadd.f32 %v3049_v18, %v2923_v5 }
 0x260   : > { %v2791_v2 = vrot.slane %v2790_v42, 4  ;;  %v3051_v62 = vadd.f32 %v3050_v37, %v2924_v21 }
 0x262   : > { %v2792_v26 = vadd.f32 %v2791_v2, %v2790_v42  ;;  %v3052_v13 = vrot.slane %v3051_v62, 4 }
 0x264   : > { %v2793_v52 = vrot.slane %v2792_v26, 2  ;;  %v3053_v51 = vadd.f32 %v3052_v13, %v3051_v62 }
 0x266   : > { %v2794_v48 = vadd.f32 %v2793_v52, %v2792_v26  ;;  %v3054_v11 = vrot.slane %v3053_v51, 2 }
 0x268   : > { %v2795_v63 = vrot.slane %v2794_v48, 1  ;;  %v3055_v49 = vadd.f32 %v3054_v11, %v3053_v51 }
 0x26a   : > { %v2796_v61 = vadd.f32 %v2795_v63, %v2794_v48  ;;  %v3056_v57 = vrot.slane %v3055_v49, 1 }
 0x26c   : > { %v3057_v46 = vadd.f32 %v3056_v57, %v3055_v49  ;;  %v3061_v40 = vsel %vm3060_vm0, %v2796_v61, 0.0 }
 0x26e   : > { %v3063_v45 = vsel %vm3062_vm1, %v3057_v46, 0.0 }
 0x26f   : > { %v3064_v23 = vadd.f32 %v3063_v45, %v3061_v40 }
 0x271   : > { %3065 = vst [vmem:[%s251_s9] sm:$0xff] %v3064_v23 }
 0x272   : > { %4453 = shalt.err (!%p4450_p2)
}
 0x273   : > { %s4454_s30 = scalar_lea.hbm %s5288_s26, 128  ;;  %s4458_s20 = scalar_lea.hbm %s5340_s3, 256 }
 0x274   : > { %p4455_p3 = scmp.ne.s32.totalorder %s5288_s26, %s4454_s30  ;;  %p4459_p4 = scmp.lt.u32.totalorder %s5288_s26, %s5340_s3 }
 0x275   : > { %p4460_p6 = scmp.lt.u32.totalorder %s4458_s20, %s4454_s30  ;;  %p4462_p12 = scmp.lt.u32.totalorder %s4454_s30, %s5288_s26 }
 0x276   : > { %p4456_p7 = pnand %p4455_p3, %p4659_p10 }
 0x277   : > { %p4461_p8 = por %p4460_p6, %p4459_p4 }
 0x278   : > { %p4457_p13 = pneg %p4456_p7 }
 0x279   : > { %p4463_p11 = por %p4462_p12, %p4461_p8 }
 0x27b   : > { %p4464_p0 = pnand %p4463_p11, %p4457_p13 }
 0x27d   : > { %4467 = shalt.err (!%p4464_p0)
}
 0x27e   : > { %4207 = dma.vmem_to_hbm [thread:$0]  (%p4659_p10), %s5290_s18, 128, %s5288_s26, %s3072_s21  }
 0x27f PF: > { %s3115_s10 = sand.u32 1, %s4510_s12   ;;  %p5418_p5 = scmp.ne.s32.totalorder %s5378_s23, 0 }
 0x280   : > { %p5419_p9 = scmp.ge.s32.totalorder %s4530_s17, 2  ;;  %s3116_s11 = scalar_lea.sflag [#allocation5], %s3115_s10 }
 0x282   : > { %p4219_p1 = pnand %p5419_p9, %p5418_p5 }
 0x284   : > { %4501 = dma.done.wait (!%p4219_p1), %s3116_s11, 8192  }
 0x285   : > { %4503 = vsyncadd (!%p4219_p1), %s3116_s11, 4294959104  ;;  %s3125_s9 = scalar_lea.sflag [#allocation10], %s3115_s10 }
 0x286   : > { %4505 = dma.done.wait (!%p4219_p1), %s3125_s9, 128  }
 0x287   : > { %4507 = vsyncadd (!%p4219_p1), %s3125_s9, 4294967168  ;;  %s24_s17 = sadd.s32 1, %s4530_s17   ;;  %s5420_s12 = smov %s4514_s13 }
 0x288   : > { %p21_p2 = scmp.ge.s32.totalorder %s24_s17, 4   ;;  %s5421_s13 = smov %s4518_s14 }
 0x289   : > { %s5422_s14 = smov %s4668_s5  ;;  %s5423_s15 = smov %s4526_s16 }
 0x28a   : > { %s5424_s16 = smov %s5426_s28  ;;  %23 = sbr.rel (!%p21_p2) target bundleno = 9 (0x9), region = 103 }
 0x291   :  { %3130 = vsyncpa [#allocation4], 1 }
 0x292   :  { %3132 = vsyncpa [#allocation4 + $0x1], 1 }
 0x293   :  { %3133 = vsyncpa [#allocation7], 1 }
 0x294   :  { %3134 = vsyncpa [#allocation5], 1 }
 0x295   :  { %3136 = vsyncpa [#allocation5 + $0x1], 1 }
 0x296   :  { %3137 = vsyncpa [#allocation10], 1 }
 0x297   :  { %3139 = vsyncpa [#allocation10 + $0x1], 1 }

</bundles_post_ra>
